<compile_context>
chip_gen: v7x
topology: tpu7x:2x2x1
jax: 0.10.0
libtpu: 0.0.40
codegen_flags: <defaults>
</compile_context>

<pallas_src>
import numpy as np
import jax
import jax.numpy as jnp
from jax.experimental import pallas as pl
from jax.experimental.pallas import tpu as pltpu


# ---------------------------------------------------------------------------
# Kernel: one (TILE_ROWS, C) tile per grid step; normalize each row over C.
# ---------------------------------------------------------------------------
def _bf_layernorm_kernel(x_ref, w_ref, o_ref):
    x = x_ref[...].astype(jnp.float32)                    # (TR, C)
    mean = jnp.mean(x, axis=-1, keepdims=True)            # XLU cross-lane reduce
    xc = x - mean
    var = jnp.mean(xc * xc, axis=-1, keepdims=True)       # unbiased=False
    inv = jax.lax.rsqrt(var + 1e-5)                       # EUP slot (free vs VALU)
    w = w_ref[...].astype(jnp.float32)                    # (1, C), broadcast
    o_ref[...] = (x * inv * w).astype(o_ref.dtype)


def biasfree_layernorm(x, weight, *, block_rows=1024):
    """BiasFree_LayerNorm over the last axis of `x` with per-channel `weight`."""
    orig_shape = x.shape
    c = int(orig_shape[-1])
    n = 1
    for d in orig_shape[:-1]:
        n *= int(d)

    x2 = x.reshape(n, c)
    w2 = weight.reshape(1, c)

    # Row tile: largest allowed tile <= block_rows.
    #   (8,128) rule: sublane dim must be a multiple of 8 OR equal the full
    #   row extent.  Lane dim == C == full extent, always legal.
    if n <= block_rows:
        br = n                      # full extent -> always legal
    else:
        br = (block_rows // 8) * 8  # multiple of 8

    grid = (pl.cdiv(n, br),)

    out = pl.pallas_call(
        _bf_layernorm_kernel,
        out_shape=jax.ShapeDtypeStruct((n, c), x.dtype),
        grid=grid,
        in_specs=[
            pl.BlockSpec((br, c), lambda i: (i, 0)),      # activations, row-tiled
            pl.BlockSpec((1, c), lambda i: (0, 0)),       # weight, resident
        ],
        out_specs=pl.BlockSpec((br, c), lambda i: (i, 0)),
        compiler_params=pltpu.CompilerParams(
            dimension_semantics=("parallel",)),
    )(x2, w2)
    return out.reshape(orig_shape)


# ---------------------------------------------------------------------------
# Pure-JAX reference (mirrors the PyTorch forward).
# ---------------------------------------------------------------------------
def reference_forward(x, weight, eps=1e-5):
    sigma = jnp.var(x.astype(jnp.float32), axis=-1, keepdims=True)  # ddof=0
    return x.astype(jnp.float32) / jnp.sqrt(sigma + eps) * weight.astype(jnp.float32)


if __name__ == "__main__":
    key = jax.random.PRNGKey(0)
    kx, kw, kx2 = jax.random.split(key, 3)

    # Case 1: small shape consistent with the module's usage on (B, H*W, C).
    b, seq, c = 2, 16 * 16, 64
    x = jax.random.normal(kx, (b, seq, c), jnp.float32)
    weight = 1.0 + 0.05 * jax.random.normal(kw, (c,), jnp.float32)

    out = jax.block_until_ready(biasfree_layernorm(x, weight))
    ref = jax.block_until_ready(reference_forward(x, weight))
    assert out.shape == x.shape
    assert np.allclose(np.asarray(out), np.asarray(ref), atol=2e-5, rtol=2e-5), \
        "Pallas output does not match reference (case 1)"

    # Case 2: lane-dense C=128, row count not a multiple of the tile
    # (exercises the cdiv grid + masked partial last block).
    b2, seq2, c2 = 4, 640, 128
    x2 = jax.random.normal(kx2, (b2, seq2, c2), jnp.float32)
    w2 = jnp.ones((c2,), jnp.float32) * 0.75
    out2 = jax.block_until_ready(biasfree_layernorm(x2, w2))
    ref2 = jax.block_until_ready(reference_forward(x2, w2))
    assert np.allclose(np.asarray(out2), np.asarray(ref2), atol=2e-5, rtol=2e-5), \
        "Pallas output does not match reference (case 2)"

    # Case 3: bf16 I/O with f32 in-kernel compute (halves HBM traffic).
    xb = x.astype(jnp.bfloat16)
    outb = jax.block_until_ready(biasfree_layernorm(xb, weight.astype(jnp.bfloat16)))
    refb = np.asarray(reference_forward(xb.astype(jnp.float32), weight))
    assert np.allclose(np.asarray(outb, dtype=np.float32), refb, atol=3e-2, rtol=3e-2), \
        "Pallas bf16 output does not match reference (case 3)"

    print("KERNEL_OK")
</pallas_src>

<mosaic_0001>
module attributes {stable_mosaic.version = 11 : i64} {
  func.func @_bf_layernorm_kernel(%arg0: i32, %arg1: memref<512x64xf32, #tpu.memory_space<vmem>>, %arg2: memref<1x64xf32, #tpu.memory_space<vmem>>, %arg3: memref<512x64xf32, #tpu.memory_space<vmem>>) attributes {dimension_semantics = [#tpu.dimension_semantics<parallel>], iteration_bounds = array<i64: 1>, scalar_prefetch = 0 : i64, scratch_operands = 0 : i64, tpu.core_type = #tpu.core_type<tc>, window_params = [{transform_indices = @transform_0, window_bounds = array<i64: 512, 64>}, {pipeline_mode = #tpu.pipeline_mode<synchronous>, transform_indices = @transform_1, window_bounds = array<i64: 1, 64>}, {transform_indices = @transform_2, window_bounds = array<i64: 512, 64>}]} {
    %c0 = arith.constant 0 : index
    %c0_0 = arith.constant 0 : index
    %0 = vector.load %arg1[%c0, %c0_0] : memref<512x64xf32, #tpu.memory_space<vmem>>, vector<512x64xf32>
    %cst = arith.constant dense<0.000000e+00> : vector<512xf32>
    %1 = vector.multi_reduction <add>, %0, %cst [1] : vector<512x64xf32> to vector<512xf32>
    %2 = vector.shape_cast %1 : vector<512xf32> to vector<512x1xf32>
    %cst_1 = arith.constant 6.400000e+01 : f32
    %3 = vector.broadcast %cst_1 : f32 to vector<512x1xf32>
    %4 = arith.divf %2, %3 : vector<512x1xf32>
    %5 = vector.broadcast %4 : vector<512x1xf32> to vector<512x64xf32>
    %6 = arith.subf %0, %5 : vector<512x64xf32>
    %7 = arith.mulf %6, %6 : vector<512x64xf32>
    %cst_2 = arith.constant dense<0.000000e+00> : vector<512xf32>
    %8 = vector.multi_reduction <add>, %7, %cst_2 [1] : vector<512x64xf32> to vector<512xf32>
    %9 = vector.shape_cast %8 : vector<512xf32> to vector<512x1xf32>
    %cst_3 = arith.constant 6.400000e+01 : f32
    %10 = vector.broadcast %cst_3 : f32 to vector<512x1xf32>
    %11 = arith.divf %9, %10 : vector<512x1xf32>
    %cst_4 = arith.constant 9.99999974E-6 : f32
    %12 = vector.broadcast %cst_4 : f32 to vector<512x1xf32>
    %13 = arith.addf %11, %12 : vector<512x1xf32>
    %14 = math.rsqrt %13 : vector<512x1xf32>
    %c0_5 = arith.constant 0 : index
    %c0_6 = arith.constant 0 : index
    %15 = vector.load %arg2[%c0_5, %c0_6] : memref<1x64xf32, #tpu.memory_space<vmem>>, vector<1x64xf32>
    %16 = vector.broadcast %14 : vector<512x1xf32> to vector<512x64xf32>
    %17 = arith.mulf %0, %16 : vector<512x64xf32>
    %18 = vector.broadcast %15 : vector<1x64xf32> to vector<512x64xf32>
    %19 = arith.mulf %17, %18 : vector<512x64xf32>
    %c0_7 = arith.constant 0 : index
    %c0_8 = arith.constant 0 : index
    %20 = vector.load %arg3[%c0_7, %c0_8] : memref<512x64xf32, #tpu.memory_space<vmem>>, vector<512x64xf32>
    tpu.vector_store %arg3[%c0_7, %c0_8], %19 {strides = array<i32>} : memref<512x64xf32, #tpu.memory_space<vmem>>, vector<512x64xf32>,
    return
  }
  func.func @transform_0(%arg0: i32) -> (i32, i32) {
    %c0_i32 = arith.constant 0 : i32
    %c0_i32_0 = arith.constant 0 : i32
    return %arg0, %c0_i32 : i32, i32
  }
  func.func @transform_1(%arg0: i32) -> (i32, i32) {
    %c0_i32 = arith.constant 0 : i32
    %c0_i32_0 = arith.constant 0 : i32
    %c0_i32_1 = arith.constant 0 : i32
    return %c0_i32, %c0_i32_0 : i32, i32
  }
  func.func @transform_2(%arg0: i32) -> (i32, i32) {
    %c0_i32 = arith.constant 0 : i32
    %c0_i32_0 = arith.constant 0 : i32
    return %arg0, %c0_i32 : i32, i32
  }
}

</mosaic_0001>

<bundles_post_ra>
// kernel: tpu_custom_call.1
= control target key start
LH: loop header
LB: loop body
LE: loop exit
PB: predicated region body
PF: predicated region fallthrough
CT: control target
= control target key end

     0   :  { %vm75_vm0 = vcmask 523264   ;;  %s2349_s0 = inlined_call_operand.vmem [shape: f32[512,64], index: 0, kind: input, shape index: {}]   ;;  %s2350_s1 = inlined_call_operand.vmem [shape: f32[1,64], index: 1, kind: input, shape index: {}]   ;;  %s2351_s2 = inlined_call_operand.vmem [shape: f32[512,64], index: 2, kind: output, shape index: {}]  }
   0x1   :  { %v1259_v0 = vld [vmem:[%s2349_s0] sm:$0xff]  ;;  %v1264_v1 = vld [vmem:[%s2349_s0 + $0x10] sm:$0xff]  ;;  %v1269_v2 = vld [vmem:[%s2349_s0 + $0x8] sm:$0xff] }
   0x2   :  { %v76_v3 = vsel %vm75_vm0, %v1259_v0, 0.0  ;;  %v82_v4 = vsel %vm75_vm0, %v1264_v1, 0.0  ;;  %v1278_v5 = vld [vmem:[%s2349_s0 + $0x18] sm:$0xff]  ;;  %v79_v6 = vsel %vm75_vm0, %v1269_v2, 0.0  ;;  %v1287_v8 = vld [vmem:[%s2349_s0 + $0x28] sm:$0xff]  ;;  %v1292_v9 = vld [vmem:[%s2349_s0 + $0x20] sm:$0xff] }
   0x3   :  { %77 = vadd.xlane.f32.xlu0 %v76_v3  ;;  %83 = vadd.xlane.f32.xlu1 %v82_v4  ;;  %v85_v7 = vsel %vm75_vm0, %v1278_v5, 0.0  ;;  %v91_v10 = vsel %vm75_vm0, %v1287_v8, 0.0  ;;  %v88_v11 = vsel %vm75_vm0, %v1292_v9, 0.0  ;;  %v1301_v12 = vld [vmem:[%s2349_s0 + $0x38] sm:$0xff]  ;;  %v1306_v13 = vld [vmem:[%s2349_s0 + $0x30] sm:$0xff]  ;;  %v1315_v16 = vld [vmem:[%s2349_s0 + $0x48] sm:$0xff] }
   0x4   :  { %v97_v14 = vsel %vm75_vm0, %v1301_v12, 0.0  ;;  %v94_v15 = vsel %vm75_vm0, %v1306_v13, 0.0  ;;  %v1320_v17 = vld [vmem:[%s2349_s0 + $0x40] sm:$0xff]  ;;  %v103_v18 = vsel %vm75_vm0, %v1315_v16, 0.0  ;;  %v1329_v20 = vld [vmem:[%s2349_s0 + $0x58] sm:$0xff]  ;;  %v1334_v21 = vld [vmem:[%s2349_s0 + $0x50] sm:$0xff] }
   0x5   :  { %v100_v19 = vsel %vm75_vm0, %v1320_v17, 0.0  ;;  %v109_v22 = vsel %vm75_vm0, %v1329_v20, 0.0  ;;  %v106_v23 = vsel %vm75_vm0, %v1334_v21, 0.0  ;;  %v1343_v24 = vld [vmem:[%s2349_s0 + $0x68] sm:$0xff]  ;;  %v1348_v25 = vld [vmem:[%s2349_s0 + $0x60] sm:$0xff]  ;;  %v1357_v28 = vld [vmem:[%s2349_s0 + $0x78] sm:$0xff] }
   0x6   :  { %v115_v26 = vsel %vm75_vm0, %v1343_v24, 0.0  ;;  %v112_v27 = vsel %vm75_vm0, %v1348_v25, 0.0  ;;  %v1362_v29 = vld [vmem:[%s2349_s0 + $0x70] sm:$0xff]  ;;  %v121_v30 = vsel %vm75_vm0, %v1357_v28, 0.0  ;;  %v1371_v32 = vld [vmem:[%s2349_s0 + $0x88] sm:$0xff]  ;;  %v1376_v33 = vld [vmem:[%s2349_s0 + $0x80] sm:$0xff] }
   0x7   :  { %80 = vadd.xlane.f32.xlu0 %v79_v6  ;;  %86 = vadd.xlane.f32.xlu1 %v85_v7  ;;  %v118_v31 = vsel %vm75_vm0, %v1362_v29, 0.0  ;;  %v127_v34 = vsel %vm75_vm0, %v1371_v32, 0.0  ;;  %v124_v35 = vsel %vm75_vm0, %v1376_v33, 0.0  ;;  %v1385_v36 = vld [vmem:[%s2349_s0 + $0x98] sm:$0xff]  ;;  %v1390_v37 = vld [vmem:[%s2349_s0 + $0x90] sm:$0xff]  ;;  %v1399_v40 = vld [vmem:[%s2349_s0 + $0xa8] sm:$0xff] }
   0x8   :  { %v133_v38 = vsel %vm75_vm0, %v1385_v36, 0.0  ;;  %v130_v39 = vsel %vm75_vm0, %v1390_v37, 0.0  ;;  %v1404_v41 = vld [vmem:[%s2349_s0 + $0xa0] sm:$0xff]  ;;  %v139_v42 = vsel %vm75_vm0, %v1399_v40, 0.0  ;;  %v1413_v44 = vld [vmem:[%s2349_s0 + $0xb8] sm:$0xff]  ;;  %v1418_v45 = vld [vmem:[%s2349_s0 + $0xb0] sm:$0xff] }
   0x9   :  { %v136_v43 = vsel %vm75_vm0, %v1404_v41, 0.0  ;;  %v145_v46 = vsel %vm75_vm0, %v1413_v44, 0.0  ;;  %v142_v47 = vsel %vm75_vm0, %v1418_v45, 0.0  ;;  %v1427_v48 = vld [vmem:[%s2349_s0 + $0xc8] sm:$0xff]  ;;  %v1432_v49 = vld [vmem:[%s2349_s0 + $0xc0] sm:$0xff]  ;;  %v1441_v52 = vld [vmem:[%s2349_s0 + $0xd8] sm:$0xff] }
   0xa   :  { %v151_v50 = vsel %vm75_vm0, %v1427_v48, 0.0  ;;  %v148_v51 = vsel %vm75_vm0, %v1432_v49, 0.0  ;;  %v1446_v53 = vld [vmem:[%s2349_s0 + $0xd0] sm:$0xff]  ;;  %v157_v54 = vsel %vm75_vm0, %v1441_v52, 0.0  ;;  %v1455_v56 = vld [vmem:[%s2349_s0 + $0xe8] sm:$0xff]  ;;  %v1460_v57 = vld [vmem:[%s2349_s0 + $0xe0] sm:$0xff] }
   0xb   :  { %92 = vadd.xlane.f32.xlu1 %v91_v10  ;;  %89 = vadd.xlane.f32.xlu0 %v88_v11  ;;  %v154_v55 = vsel %vm75_vm0, %v1446_v53, 0.0  ;;  %v163_v58 = vsel %vm75_vm0, %v1455_v56, 0.0  ;;  %v160_v59 = vsel %vm75_vm0, %v1460_v57, 0.0  ;;  %v1469_v60 = vld [vmem:[%s2349_s0 + $0xf8] sm:$0xff]  ;;  %v1474_v61 = vld [vmem:[%s2349_s0 + $0xf0] sm:$0xff]  ;;  %v1483_v3 = vld [vmem:[%s2349_s0 + $0x108] sm:$0xff] }
   0xc   :  { %v169_v62 = vsel %vm75_vm0, %v1469_v60, 0.0  ;;  %v166_v63 = vsel %vm75_vm0, %v1474_v61, 0.0  ;;  %v1488_v4 = vld [vmem:[%s2349_s0 + $0x100] sm:$0xff]  ;;  %v175_v6 = vsel %vm75_vm0, %v1483_v3, 0.0  ;;  %v1497_v10 = vld [vmem:[%s2349_s0 + $0x118] sm:$0xff]  ;;  %v1502_v11 = vld [vmem:[%s2349_s0 + $0x110] sm:$0xff] }
   0xd   :  { %v172_v7 = vsel %vm75_vm0, %v1488_v4, 0.0 }
   0xf   :  { %98 = vadd.xlane.f32.xlu1 %v97_v14  ;;  %95 = vadd.xlane.f32.xlu0 %v94_v15  ;;  %v181_v14 = vsel %vm75_vm0, %v1497_v10, 0.0  ;;  %v178_v15 = vsel %vm75_vm0, %v1502_v11, 0.0 }
  0x13   :  { %104 = vadd.xlane.f32.xlu1 %v103_v18  ;;  %101 = vadd.xlane.f32.xlu0 %v100_v19  ;;  %v1511_v18 = vld [vmem:[%s2349_s0 + $0x128] sm:$0xff]  ;;  %v1516_v19 = vld [vmem:[%s2349_s0 + $0x120] sm:$0xff] }
  0x17   :  { %110 = vadd.xlane.f32.xlu1 %v109_v22  ;;  %107 = vadd.xlane.f32.xlu0 %v106_v23  ;;  %v187_v22 = vsel %vm75_vm0, %v1511_v18, 0.0  ;;  %v184_v23 = vsel %vm75_vm0, %v1516_v19, 0.0 }
  0x1b   :  { %116 = vadd.xlane.f32.xlu1 %v115_v26  ;;  %113 = vadd.xlane.f32.xlu0 %v112_v27  ;;  %v1525_v26 = vld [vmem:[%s2349_s0 + $0x138] sm:$0xff]  ;;  %v1530_v27 = vld [vmem:[%s2349_s0 + $0x130] sm:$0xff] }
  0x1f   :  { %122 = vadd.xlane.f32.xlu1 %v121_v30  ;;  %119 = vadd.xlane.f32.xlu0 %v118_v31  ;;  %v193_v30 = vsel %vm75_vm0, %v1525_v26, 0.0  ;;  %v190_v31 = vsel %vm75_vm0, %v1530_v27, 0.0 }
  0x23   :  { %128 = vadd.xlane.f32.xlu1 %v127_v34  ;;  %125 = vadd.xlane.f32.xlu0 %v124_v35  ;;  %v1539_v34 = vld [vmem:[%s2349_s0 + $0x148] sm:$0xff]  ;;  %v1544_v35 = vld [vmem:[%s2349_s0 + $0x140] sm:$0xff] }
  0x27   :  { %134 = vadd.xlane.f32.xlu1 %v133_v38  ;;  %131 = vadd.xlane.f32.xlu0 %v130_v39  ;;  %v199_v38 = vsel %vm75_vm0, %v1539_v34, 0.0  ;;  %v196_v39 = vsel %vm75_vm0, %v1544_v35, 0.0 }
  0x2b   :  { %140 = vadd.xlane.f32.xlu1 %v139_v42  ;;  %137 = vadd.xlane.f32.xlu0 %v136_v43  ;;  %v1553_v42 = vld [vmem:[%s2349_s0 + $0x158] sm:$0xff]  ;;  %v1558_v43 = vld [vmem:[%s2349_s0 + $0x150] sm:$0xff] }
  0x2f   :  { %146 = vadd.xlane.f32.xlu1 %v145_v46  ;;  %143 = vadd.xlane.f32.xlu0 %v142_v47  ;;  %v205_v46 = vsel %vm75_vm0, %v1553_v42, 0.0  ;;  %v202_v47 = vsel %vm75_vm0, %v1558_v43, 0.0 }
  0x33   :  { %152 = vadd.xlane.f32.xlu1 %v151_v50  ;;  %149 = vadd.xlane.f32.xlu0 %v148_v51  ;;  %v1567_v50 = vld [vmem:[%s2349_s0 + $0x168] sm:$0xff]  ;;  %v1572_v51 = vld [vmem:[%s2349_s0 + $0x160] sm:$0xff] }
  0x37   :  { %158 = vadd.xlane.f32.xlu1 %v157_v54  ;;  %155 = vadd.xlane.f32.xlu0 %v154_v55  ;;  %v211_v54 = vsel %vm75_vm0, %v1567_v50, 0.0  ;;  %v208_v55 = vsel %vm75_vm0, %v1572_v51, 0.0 }
  0x3b   :  { %164 = vadd.xlane.f32.xlu1 %v163_v58  ;;  %161 = vadd.xlane.f32.xlu0 %v160_v59  ;;  %v1581_v58 = vld [vmem:[%s2349_s0 + $0x178] sm:$0xff]  ;;  %v1586_v59 = vld [vmem:[%s2349_s0 + $0x170] sm:$0xff] }
  0x3f   :  { %170 = vadd.xlane.f32.xlu1 %v169_v62  ;;  %167 = vadd.xlane.f32.xlu0 %v166_v63  ;;  %v217_v62 = vsel %vm75_vm0, %v1581_v58, 0.0  ;;  %v214_v63 = vsel %vm75_vm0, %v1586_v59, 0.0 }
  0x43   :  { %176 = vadd.xlane.f32.xlu1 %v175_v6  ;;  %173 = vadd.xlane.f32.xlu0 %v172_v7  ;;  %v1595_v6 = vld [vmem:[%s2349_s0 + $0x188] sm:$0xff]  ;;  %v1600_v7 = vld [vmem:[%s2349_s0 + $0x180] sm:$0xff] }
  0x44   :  { %2368 = vst [vmem:[#allocation2_spill] sm:$0xff] %v1595_v6  ;;  %2369 = vst [vmem:[#allocation3_spill] sm:$0xff] %v1600_v7 }
  0x47   :  { %182 = vadd.xlane.f32.xlu1 %v181_v14  ;;  %179 = vadd.xlane.f32.xlu0 %v178_v15  ;;  %v223_v14 = vsel %vm75_vm0, %v1595_v6, 0.0  ;;  %v220_v15 = vsel %vm75_vm0, %v1600_v7, 0.0 }
  0x4b   :  { %188 = vadd.xlane.f32.xlu1 %v187_v22  ;;  %185 = vadd.xlane.f32.xlu0 %v184_v23  ;;  %v1609_v22 = vld [vmem:[%s2349_s0 + $0x198] sm:$0xff]  ;;  %v1614_v23 = vld [vmem:[%s2349_s0 + $0x190] sm:$0xff] }
  0x4c   :  { %2370 = vst [vmem:[#allocation4_spill] sm:$0xff] %v1609_v22  ;;  %2371 = vst [vmem:[#allocation5_spill] sm:$0xff] %v1614_v23 }
  0x4f   :  { %194 = vadd.xlane.f32.xlu1 %v193_v30  ;;  %191 = vadd.xlane.f32.xlu0 %v190_v31  ;;  %v229_v30 = vsel %vm75_vm0, %v1609_v22, 0.0  ;;  %v226_v31 = vsel %vm75_vm0, %v1614_v23, 0.0 }
  0x53   :  { %200 = vadd.xlane.f32.xlu1 %v199_v38  ;;  %197 = vadd.xlane.f32.xlu0 %v196_v39  ;;  %v1623_v38 = vld [vmem:[%s2349_s0 + $0x1a8] sm:$0xff]  ;;  %v1628_v39 = vld [vmem:[%s2349_s0 + $0x1a0] sm:$0xff] }
  0x54   :  { %2372 = vst [vmem:[#allocation6_spill] sm:$0xff] %v1623_v38  ;;  %2373 = vst [vmem:[#allocation7_spill] sm:$0xff] %v1628_v39 }
  0x57   :  { %206 = vadd.xlane.f32.xlu1 %v205_v46  ;;  %203 = vadd.xlane.f32.xlu0 %v202_v47  ;;  %v235_v46 = vsel %vm75_vm0, %v1623_v38, 0.0  ;;  %v232_v47 = vsel %vm75_vm0, %v1628_v39, 0.0 }
  0x5b   :  { %212 = vadd.xlane.f32.xlu1 %v211_v54  ;;  %209 = vadd.xlane.f32.xlu0 %v208_v55  ;;  %v1637_v54 = vld [vmem:[%s2349_s0 + $0x1b8] sm:$0xff]  ;;  %v1642_v55 = vld [vmem:[%s2349_s0 + $0x1b0] sm:$0xff] }
  0x5c   :  { %2374 = vst [vmem:[#allocation8_spill] sm:$0xff] %v1637_v54  ;;  %2375 = vst [vmem:[#allocation9_spill] sm:$0xff] %v1642_v55 }
  0x5f   :  { %218 = vadd.xlane.f32.xlu1 %v217_v62  ;;  %215 = vadd.xlane.f32.xlu0 %v214_v63  ;;  %v241_v62 = vsel %vm75_vm0, %v1637_v54, 0.0  ;;  %v238_v63 = vsel %vm75_vm0, %v1642_v55, 0.0 }
  0x63   :  { %224 = vadd.xlane.f32.xlu1 %v223_v14  ;;  %221 = vadd.xlane.f32.xlu0 %v220_v15  ;;  %v1651_v14 = vld [vmem:[%s2349_s0 + $0x1c8] sm:$0xff]  ;;  %v1656_v15 = vld [vmem:[%s2349_s0 + $0x1c0] sm:$0xff] }
  0x64   :  { %2376 = vst [vmem:[#allocation10_spill] sm:$0xff] %v1651_v14  ;;  %2377 = vst [vmem:[#allocation11_spill] sm:$0xff] %v1656_v15 }
  0x67   :  { %230 = vadd.xlane.f32.xlu1 %v229_v30  ;;  %227 = vadd.xlane.f32.xlu0 %v226_v31  ;;  %v247_v30 = vsel %vm75_vm0, %v1651_v14, 0.0  ;;  %v244_v31 = vsel %vm75_vm0, %v1656_v15, 0.0  ;;  %v1679_v15 = vld [vmem:[%s2349_s0 + $0x1e8] sm:$0xff]  ;;  %v1684_v14 = vld [vmem:[%s2349_s0 + $0x1e0] sm:$0xff] }
  0x68   :  { %2380 = vst [vmem:[#allocation14_spill] sm:$0xff] %v1679_v15  ;;  %2381 = vst [vmem:[#allocation15_spill] sm:$0xff] %v1684_v14 }
  0x6b   :  { %236 = vadd.xlane.f32.xlu1 %v235_v46  ;;  %233 = vadd.xlane.f32.xlu0 %v232_v47  ;;  %v1665_v46 = vld [vmem:[%s2349_s0 + $0x1d8] sm:$0xff]  ;;  %v1670_v47 = vld [vmem:[%s2349_s0 + $0x1d0] sm:$0xff] }
  0x6c   :  { %2378 = vst [vmem:[#allocation12_spill] sm:$0xff] %v1665_v46  ;;  %2379 = vst [vmem:[#allocation13_spill] sm:$0xff] %v1670_v47 }
  0x6f   :  { %242 = vadd.xlane.f32.xlu1 %v241_v62  ;;  %239 = vadd.xlane.f32.xlu0 %v238_v63  ;;  %v253_v62 = vsel %vm75_vm0, %v1665_v46, 0.0  ;;  %v250_v63 = vsel %vm75_vm0, %v1670_v47, 0.0  ;;  %v1693_v47 = vld [vmem:[%s2349_s0 + $0x1f8] sm:$0xff]  ;;  %v1698_v46 = vld [vmem:[%s2349_s0 + $0x1f0] sm:$0xff] }
  0x70   :  { %2382 = vst [vmem:[#allocation16_spill] sm:$0xff] %v1693_v47  ;;  %2383 = vst [vmem:[#allocation17_spill] sm:$0xff] %v1698_v46 }
  0x73   :  { %248 = vadd.xlane.f32.xlu1 %v247_v30  ;;  %245 = vadd.xlane.f32.xlu0 %v244_v31  ;;  %v259_v30 = vsel %vm75_vm0, %v1679_v15, 0.0  ;;  %v256_v31 = vsel %vm75_vm0, %v1684_v14, 0.0 }
  0x77   :  { %254 = vadd.xlane.f32.xlu1 %v253_v62  ;;  %251 = vadd.xlane.f32.xlu0 %v250_v63  ;;  %v265_v62 = vsel %vm75_vm0, %v1693_v47, 0.0  ;;  %v262_v63 = vsel %vm75_vm0, %v1698_v46, 0.0 }
  0x7b   :  { %260 = vadd.xlane.f32.xlu1 %v259_v30  ;;  %257 = vadd.xlane.f32.xlu0 %v256_v31 }
  0x7f   :  { %266 = vadd.xlane.f32.xlu1 %v265_v62  ;;  %263 = vadd.xlane.f32.xlu0 %v262_v63 }
  0x90   :  { %v78_v14 = vpop.xlane.xlu0 %77  ;;  %v84_v15 = vpop.xlane.xlu1 %83 }
  0x91   :  { %v269_v55 = vmul.f32 0.015625, %v78_v14  ;;  %v271_v54 = vmul.f32 0.015625, %v84_v15 }
  0x93   :  { %v333_v39 = vsub.f32 %v1259_v0, %v269_v55  ;;  %v335_v38 = vsub.f32 %v1264_v1, %v271_v54 }
  0x94   :  { %v81_v23 = vpop.xlane.xlu0 %80  ;;  %v87_v22 = vpop.xlane.xlu1 %86 }
  0x95   :  { %v270_v30 = vmul.f32 0.015625, %v81_v23  ;;  %v272_v31 = vmul.f32 0.015625, %v87_v22  ;;  %v397_v7 = vmul.f32 %v333_v39, %v333_v39  ;;  %v399_v6 = vmul.f32 %v335_v38, %v335_v38 }
  0x97   :  { %v461_v47 = vsel %vm75_vm0, %v397_v7, 0.0  ;;  %v334_v46 = vsub.f32 %v1269_v2, %v270_v30  ;;  %v336_v62 = vsub.f32 %v1278_v5, %v272_v31  ;;  %v467_v14 = vsel %vm75_vm0, %v399_v6, 0.0 }
  0x98   :  { %462 = vadd.xlane.f32.xlu0 %v461_v47  ;;  %v93_v63 = vpop.xlane.xlu1 %92  ;;  %v90_v15 = vpop.xlane.xlu0 %89 }
  0x99   :  { %v274_v0 = vmul.f32 0.015625, %v93_v63  ;;  %v398_v55 = vmul.f32 %v334_v46, %v334_v46  ;;  %v273_v1 = vmul.f32 0.015625, %v90_v15  ;;  %v400_v54 = vmul.f32 %v336_v62, %v336_v62 }
  0x9b   :  { %v464_v23 = vsel %vm75_vm0, %v398_v55, 0.0  ;;  %v338_v22 = vsub.f32 %v1287_v8, %v274_v0  ;;  %v337_v38 = vsub.f32 %v1292_v9, %v273_v1  ;;  %v470_v5 = vsel %vm75_vm0, %v400_v54, 0.0 }
  0x9c   :  { %468 = vadd.xlane.f32.xlu0 %v467_v14  ;;  %465 = vadd.xlane.f32.xlu1 %v464_v23  ;;  %v99_v2 = vpop.xlane.xlu1 %98  ;;  %v96_v7 = vpop.xlane.xlu0 %95 }
  0x9d   :  { %v276_v39 = vmul.f32 0.015625, %v99_v2  ;;  %v275_v47 = vmul.f32 0.015625, %v96_v7  ;;  %v402_v6 = vmul.f32 %v338_v22, %v338_v22  ;;  %v401_v30 = vmul.f32 %v337_v38, %v337_v38 }
  0x9f   :  { %v473_v46 = vsel %vm75_vm0, %v401_v30, 0.0  ;;  %v340_v31 = vsub.f32 %v1301_v12, %v276_v39  ;;  %v339_v62 = vsub.f32 %v1306_v13, %v275_v47  ;;  %v476_v9 = vsel %vm75_vm0, %v402_v6, 0.0 }
  0xa0   :  { %471 = vadd.xlane.f32.xlu1 %v470_v5  ;;  %v105_v8 = vpop.xlane.xlu1 %104  ;;  %474 = vadd.xlane.f32.xlu0 %v473_v46  ;;  %v102_v63 = vpop.xlane.xlu0 %101 }
  0xa1   :  { %v278_v14 = vmul.f32 0.015625, %v105_v8  ;;  %v277_v15 = vmul.f32 0.015625, %v102_v63  ;;  %v404_v0 = vmul.f32 %v340_v31, %v340_v31  ;;  %v403_v55 = vmul.f32 %v339_v62, %v339_v62 }
  0xa3   :  { %v479_v1 = vsel %vm75_vm0, %v403_v55, 0.0  ;;  %v342_v54 = vsub.f32 %v1315_v16, %v278_v14  ;;  %v341_v23 = vsub.f32 %v1320_v17, %v277_v15  ;;  %v482_v13 = vsel %vm75_vm0, %v404_v0, 0.0 }
  0xa4   :  { %477 = vadd.xlane.f32.xlu1 %v476_v9  ;;  %v111_v12 = vpop.xlane.xlu1 %110  ;;  %480 = vadd.xlane.f32.xlu0 %v479_v1  ;;  %v108_v22 = vpop.xlane.xlu0 %107 }
  0xa5   :  { %v280_v38 = vmul.f32 0.015625, %v111_v12  ;;  %v279_v2 = vmul.f32 0.015625, %v108_v22  ;;  %v406_v5 = vmul.f32 %v342_v54, %v342_v54  ;;  %v405_v7 = vmul.f32 %v341_v23, %v341_v23 }
  0xa7   :  { %v485_v39 = vsel %vm75_vm0, %v405_v7, 0.0  ;;  %v344_v47 = vsub.f32 %v1329_v20, %v280_v38  ;;  %v343_v6 = vsub.f32 %v1334_v21, %v279_v2  ;;  %v488_v17 = vsel %vm75_vm0, %v406_v5, 0.0 }
  0xa8   :  { %483 = vadd.xlane.f32.xlu1 %v482_v13  ;;  %v117_v16 = vpop.xlane.xlu1 %116  ;;  %486 = vadd.xlane.f32.xlu0 %v485_v39  ;;  %v114_v30 = vpop.xlane.xlu0 %113 }
  0xa9   :  { %v282_v46 = vmul.f32 0.015625, %v117_v16  ;;  %v281_v31 = vmul.f32 0.015625, %v114_v30  ;;  %v408_v62 = vmul.f32 %v344_v47, %v344_v47  ;;  %v407_v8 = vmul.f32 %v343_v6, %v343_v6 }
  0xab   :  { %v491_v9 = vsel %vm75_vm0, %v407_v8, 0.0  ;;  %v346_v63 = vsub.f32 %v1343_v24, %v282_v46  ;;  %v345_v14 = vsub.f32 %v1348_v25, %v281_v31  ;;  %v494_v21 = vsel %vm75_vm0, %v408_v62, 0.0 }
  0xac   :  { %489 = vadd.xlane.f32.xlu1 %v488_v17  ;;  %v123_v20 = vpop.xlane.xlu1 %122  ;;  %492 = vadd.xlane.f32.xlu0 %v491_v9  ;;  %v120_v15 = vpop.xlane.xlu0 %119 }
  0xad   :  { %v284_v0 = vmul.f32 0.015625, %v123_v20  ;;  %v283_v55 = vmul.f32 0.015625, %v120_v15  ;;  %v410_v1 = vmul.f32 %v346_v63, %v346_v63  ;;  %v409_v54 = vmul.f32 %v345_v14, %v345_v14 }
  0xaf   :  { %v497_v23 = vsel %vm75_vm0, %v409_v54, 0.0  ;;  %v348_v12 = vsub.f32 %v1357_v28, %v284_v0  ;;  %v347_v13 = vsub.f32 %v1362_v29, %v283_v55  ;;  %v500_v25 = vsel %vm75_vm0, %v410_v1, 0.0 }
  0xb0   :  { %495 = vadd.xlane.f32.xlu1 %v494_v21  ;;  %v129_v24 = vpop.xlane.xlu1 %128  ;;  %498 = vadd.xlane.f32.xlu0 %v497_v23  ;;  %v126_v22 = vpop.xlane.xlu0 %125 }
  0xb1   :  { %v286_v38 = vmul.f32 0.015625, %v129_v24  ;;  %v285_v2 = vmul.f32 0.015625, %v126_v22  ;;  %v412_v5 = vmul.f32 %v348_v12, %v348_v12  ;;  %v411_v7 = vmul.f32 %v347_v13, %v347_v13 }
  0xb3   :  { %v503_v39 = vsel %vm75_vm0, %v411_v7, 0.0  ;;  %v350_v47 = vsub.f32 %v1371_v32, %v286_v38  ;;  %v349_v6 = vsub.f32 %v1376_v33, %v285_v2  ;;  %v506_v29 = vsel %vm75_vm0, %v412_v5, 0.0 }
  0xb4   :  { %501 = vadd.xlane.f32.xlu1 %v500_v25  ;;  %v135_v28 = vpop.xlane.xlu1 %134  ;;  %504 = vadd.xlane.f32.xlu0 %v503_v39  ;;  %v132_v16 = vpop.xlane.xlu0 %131 }
  0xb5   :  { %v288_v17 = vmul.f32 0.015625, %v135_v28  ;;  %v287_v30 = vmul.f32 0.015625, %v132_v16  ;;  %v414_v46 = vmul.f32 %v350_v47, %v350_v47  ;;  %v413_v31 = vmul.f32 %v349_v6, %v349_v6 }
  0xb7   :  { %v509_v62 = vsel %vm75_vm0, %v413_v31, 0.0  ;;  %v352_v8 = vsub.f32 %v1385_v36, %v288_v17  ;;  %v351_v9 = vsub.f32 %v1390_v37, %v287_v30  ;;  %v512_v33 = vsel %vm75_vm0, %v414_v46, 0.0 }
  0xb8   :  { %507 = vadd.xlane.f32.xlu1 %v506_v29  ;;  %v141_v32 = vpop.xlane.xlu1 %140  ;;  %510 = vadd.xlane.f32.xlu0 %v509_v62  ;;  %v138_v63 = vpop.xlane.xlu0 %137 }
  0xb9   :  { %v290_v14 = vmul.f32 0.015625, %v141_v32  ;;  %v289_v20 = vmul.f32 0.015625, %v138_v63  ;;  %v416_v21 = vmul.f32 %v352_v8, %v352_v8  ;;  %v415_v15 = vmul.f32 %v351_v9, %v351_v9 }
  0xbb   :  { %v515_v0 = vsel %vm75_vm0, %v415_v15, 0.0  ;;  %v354_v55 = vsub.f32 %v1399_v40, %v290_v14  ;;  %v353_v1 = vsub.f32 %v1404_v41, %v289_v20  ;;  %v518_v37 = vsel %vm75_vm0, %v416_v21, 0.0 }
  0xbc   :  { %513 = vadd.xlane.f32.xlu1 %v512_v33  ;;  %v147_v36 = vpop.xlane.xlu1 %146  ;;  %516 = vadd.xlane.f32.xlu0 %v515_v0  ;;  %v144_v54 = vpop.xlane.xlu0 %143 }
  0xbd   :  { %v292_v23 = vmul.f32 0.015625, %v147_v36  ;;  %v291_v12 = vmul.f32 0.015625, %v144_v54  ;;  %v418_v13 = vmul.f32 %v354_v55, %v354_v55  ;;  %v417_v24 = vmul.f32 %v353_v1, %v353_v1 }
  0xbf   :  { %v521_v25 = vsel %vm75_vm0, %v417_v24, 0.0  ;;  %v356_v22 = vsub.f32 %v1413_v44, %v292_v23  ;;  %v355_v38 = vsub.f32 %v1418_v45, %v291_v12  ;;  %v524_v41 = vsel %vm75_vm0, %v418_v13, 0.0 }
  0xc0   :  { %519 = vadd.xlane.f32.xlu1 %v518_v37  ;;  %v153_v40 = vpop.xlane.xlu1 %152  ;;  %522 = vadd.xlane.f32.xlu0 %v521_v25  ;;  %v150_v2 = vpop.xlane.xlu0 %149 }
  0xc1   :  { %v294_v5 = vmul.f32 0.015625, %v153_v40  ;;  %v293_v7 = vmul.f32 0.015625, %v150_v2  ;;  %v420_v39 = vmul.f32 %v356_v22, %v356_v22  ;;  %v419_v47 = vmul.f32 %v355_v38, %v355_v38 }
  0xc3   :  { %v527_v6 = vsel %vm75_vm0, %v419_v47, 0.0  ;;  %v358_v28 = vsub.f32 %v1427_v48, %v294_v5  ;;  %v357_v29 = vsub.f32 %v1432_v49, %v293_v7  ;;  %v530_v45 = vsel %vm75_vm0, %v420_v39, 0.0 }
  0xc4   :  { %525 = vadd.xlane.f32.xlu1 %v524_v41  ;;  %v159_v44 = vpop.xlane.xlu1 %158  ;;  %528 = vadd.xlane.f32.xlu0 %v527_v6  ;;  %v156_v16 = vpop.xlane.xlu0 %155 }
  0xc5   :  { %v296_v17 = vmul.f32 0.015625, %v159_v44  ;;  %v295_v30 = vmul.f32 0.015625, %v156_v16  ;;  %v422_v46 = vmul.f32 %v358_v28, %v358_v28  ;;  %v421_v31 = vmul.f32 %v357_v29, %v357_v29 }
  0xc7   :  { %v533_v62 = vsel %vm75_vm0, %v421_v31, 0.0  ;;  %v360_v8 = vsub.f32 %v1441_v52, %v296_v17  ;;  %v359_v9 = vsub.f32 %v1446_v53, %v295_v30  ;;  %v536_v49 = vsel %vm75_vm0, %v422_v46, 0.0 }
  0xc8   :  { %531 = vadd.xlane.f32.xlu1 %v530_v45  ;;  %v165_v48 = vpop.xlane.xlu1 %164  ;;  %534 = vadd.xlane.f32.xlu0 %v533_v62  ;;  %v162_v32 = vpop.xlane.xlu0 %161 }
  0xc9   :  { %v298_v33 = vmul.f32 0.015625, %v165_v48  ;;  %v297_v63 = vmul.f32 0.015625, %v162_v32  ;;  %v424_v14 = vmul.f32 %v360_v8, %v360_v8  ;;  %v423_v20 = vmul.f32 %v359_v9, %v359_v9 }
  0xcb   :  { %v539_v21 = vsel %vm75_vm0, %v423_v20, 0.0  ;;  %v362_v15 = vsub.f32 %v1455_v56, %v298_v33  ;;  %v361_v0 = vsub.f32 %v1460_v57, %v297_v63  ;;  %v542_v53 = vsel %vm75_vm0, %v424_v14, 0.0 }
  0xcc   :  { %537 = vadd.xlane.f32.xlu1 %v536_v49  ;;  %v171_v52 = vpop.xlane.xlu1 %170  ;;  %540 = vadd.xlane.f32.xlu0 %v539_v21  ;;  %v168_v55 = vpop.xlane.xlu0 %167 }
  0xcd   :  { %v300_v1 = vmul.f32 0.015625, %v171_v52  ;;  %v299_v36 = vmul.f32 0.015625, %v168_v55  ;;  %v426_v37 = vmul.f32 %v362_v15, %v362_v15  ;;  %v425_v54 = vmul.f32 %v361_v0, %v361_v0 }
  0xcf   :  { %v364_v23 = vsub.f32 %v1469_v60, %v300_v1  ;;  %v363_v12 = vsub.f32 %v1474_v61, %v299_v36  ;;  %v545_v13 = vsel %vm75_vm0, %v425_v54, 0.0  ;;  %v548_v57 = vsel %vm75_vm0, %v426_v37, 0.0 }
  0xd0   :  { %543 = vadd.xlane.f32.xlu1 %v542_v53  ;;  %v177_v56 = vpop.xlane.xlu1 %176  ;;  %546 = vadd.xlane.f32.xlu0 %v545_v13  ;;  %v174_v24 = vpop.xlane.xlu0 %173 }
  0xd1   :  { %v302_v25 = vmul.f32 0.015625, %v177_v56  ;;  %v301_v22 = vmul.f32 0.015625, %v174_v24  ;;  %v428_v38 = vmul.f32 %v364_v23, %v364_v23  ;;  %v427_v40 = vmul.f32 %v363_v12, %v363_v12 }
  0xd3   :  { %v366_v41 = vsub.f32 %v1483_v3, %v302_v25  ;;  %v365_v2 = vsub.f32 %v1488_v4, %v301_v22  ;;  %v551_v60 = vsel %vm75_vm0, %v427_v40, 0.0  ;;  %v554_v5 = vsel %vm75_vm0, %v428_v38, 0.0 }
  0xd4   :  { %549 = vadd.xlane.f32.xlu1 %v548_v57  ;;  %v183_v61 = vpop.xlane.xlu1 %182  ;;  %552 = vadd.xlane.f32.xlu0 %v551_v60  ;;  %v180_v7 = vpop.xlane.xlu0 %179 }
  0xd5   :  { %v304_v39 = vmul.f32 0.015625, %v183_v61  ;;  %v303_v47 = vmul.f32 0.015625, %v180_v7  ;;  %v430_v6 = vmul.f32 %v366_v41, %v366_v41  ;;  %v429_v28 = vmul.f32 %v365_v2, %v365_v2 }
  0xd7   :  { %v368_v29 = vsub.f32 %v1497_v10, %v304_v39  ;;  %v367_v44 = vsub.f32 %v1502_v11, %v303_v47  ;;  %v557_v3 = vsel %vm75_vm0, %v429_v28, 0.0  ;;  %v560_v45 = vsel %vm75_vm0, %v430_v6, 0.0 }
  0xd8   :  { %555 = vadd.xlane.f32.xlu1 %v554_v5  ;;  %v189_v4 = vpop.xlane.xlu1 %188  ;;  %558 = vadd.xlane.f32.xlu0 %v557_v3  ;;  %v186_v16 = vpop.xlane.xlu0 %185 }
  0xd9   :  { %v432_v17 = vmul.f32 %v368_v29, %v368_v29  ;;  %v431_v30 = vmul.f32 %v367_v44, %v367_v44  ;;  %v306_v46 = vmul.f32 0.015625, %v189_v4  ;;  %v305_v31 = vmul.f32 0.015625, %v186_v16 }
  0xdb   :  { %v370_v62 = vsub.f32 %v1511_v18, %v306_v46  ;;  %v369_v8 = vsub.f32 %v1516_v19, %v305_v31  ;;  %v563_v10 = vsel %vm75_vm0, %v431_v30, 0.0  ;;  %v566_v9 = vsel %vm75_vm0, %v432_v17, 0.0  ;;  %v2384_v46 = vld [vmem:[#allocation2_spill] sm:$0xff] }
  0xdc   :  { %561 = vadd.xlane.f32.xlu1 %v560_v45  ;;  %v195_v11 = vpop.xlane.xlu1 %194  ;;  %564 = vadd.xlane.f32.xlu0 %v563_v10  ;;  %v192_v48 = vpop.xlane.xlu0 %191 }
  0xdd   :  { %v434_v49 = vmul.f32 %v370_v62, %v370_v62  ;;  %v433_v32 = vmul.f32 %v369_v8, %v369_v8  ;;  %v308_v33 = vmul.f32 0.015625, %v195_v11  ;;  %v307_v63 = vmul.f32 0.015625, %v192_v48  ;;  %v2385_v62 = vld [vmem:[#allocation3_spill] sm:$0xff] }
  0xdf   :  { %v372_v14 = vsub.f32 %v1525_v26, %v308_v33  ;;  %v371_v20 = vsub.f32 %v1530_v27, %v307_v63  ;;  %v569_v18 = vsel %vm75_vm0, %v433_v32, 0.0  ;;  %v572_v21 = vsel %vm75_vm0, %v434_v49, 0.0  ;;  %v2386_v33 = vld [vmem:[#allocation4_spill] sm:$0xff] }
  0xe0   :  { %567 = vadd.xlane.f32.xlu1 %v566_v9  ;;  %v201_v19 = vpop.xlane.xlu1 %200  ;;  %570 = vadd.xlane.f32.xlu0 %v569_v18  ;;  %v198_v15 = vpop.xlane.xlu0 %197 }
  0xe1   :  { %v436_v0 = vmul.f32 %v372_v14, %v372_v14  ;;  %v435_v52 = vmul.f32 %v371_v20, %v371_v20  ;;  %v310_v53 = vmul.f32 0.015625, %v201_v19  ;;  %v309_v55 = vmul.f32 0.015625, %v198_v15  ;;  %v2387_v14 = vld [vmem:[#allocation5_spill] sm:$0xff] }
  0xe3   :  { %v374_v1 = vsub.f32 %v1539_v34, %v310_v53  ;;  %v373_v36 = vsub.f32 %v1544_v35, %v309_v55  ;;  %v575_v26 = vsel %vm75_vm0, %v435_v52, 0.0  ;;  %v578_v37 = vsel %vm75_vm0, %v436_v0, 0.0 }
  0xe4   :  { %573 = vadd.xlane.f32.xlu1 %v572_v21  ;;  %v207_v27 = vpop.xlane.xlu1 %206  ;;  %576 = vadd.xlane.f32.xlu0 %v575_v26  ;;  %v204_v54 = vpop.xlane.xlu0 %203  ;;  %v2389_v26 = vld [vmem:[#allocation7_spill] sm:$0xff] }
  0xe5   :  { %v438_v23 = vmul.f32 %v374_v1, %v374_v1  ;;  %v437_v12 = vmul.f32 %v373_v36, %v373_v36  ;;  %v312_v13 = vmul.f32 0.015625, %v207_v27  ;;  %v311_v56 = vmul.f32 0.015625, %v204_v54  ;;  %v2388_v1 = vld [vmem:[#allocation6_spill] sm:$0xff] }
  0xe7   :  { %v376_v57 = vsub.f32 %v1553_v42, %v312_v13  ;;  %v375_v24 = vsub.f32 %v1558_v43, %v311_v56  ;;  %v581_v34 = vsel %vm75_vm0, %v437_v12, 0.0  ;;  %v584_v25 = vsel %vm75_vm0, %v438_v23, 0.0 }
  0xe8   :  { %579 = vadd.xlane.f32.xlu1 %v578_v37  ;;  %v213_v35 = vpop.xlane.xlu1 %212  ;;  %582 = vadd.xlane.f32.xlu0 %v581_v34  ;;  %v210_v22 = vpop.xlane.xlu0 %209  ;;  %v2390_v34 = vld [vmem:[#allocation8_spill] sm:$0xff] }
  0xe9   :  { %v440_v38 = vmul.f32 %v376_v57, %v376_v57  ;;  %v439_v40 = vmul.f32 %v375_v24, %v375_v24  ;;  %v314_v41 = vmul.f32 0.015625, %v213_v35  ;;  %v313_v2 = vmul.f32 0.015625, %v210_v22 }
  0xeb   :  { %v378_v60 = vsub.f32 %v1567_v50, %v314_v41  ;;  %v377_v61 = vsub.f32 %v1572_v51, %v313_v2  ;;  %v587_v42 = vsel %vm75_vm0, %v439_v40, 0.0  ;;  %v590_v5 = vsel %vm75_vm0, %v440_v38, 0.0 }
  0xec   :  { %585 = vadd.xlane.f32.xlu1 %v584_v25  ;;  %v219_v43 = vpop.xlane.xlu1 %218  ;;  %588 = vadd.xlane.f32.xlu0 %v587_v42  ;;  %v216_v7 = vpop.xlane.xlu0 %215  ;;  %v2391_v25 = vld [vmem:[#allocation9_spill] sm:$0xff] }
  0xed   :  { %v442_v39 = vmul.f32 %v378_v60, %v378_v60  ;;  %v441_v47 = vmul.f32 %v377_v61, %v377_v61  ;;  %v316_v6 = vmul.f32 0.015625, %v219_v43  ;;  %v315_v28 = vmul.f32 0.015625, %v216_v7 }
  0xef   :  { %v380_v29 = vsub.f32 %v1581_v58, %v316_v6  ;;  %v379_v44 = vsub.f32 %v1586_v59, %v315_v28  ;;  %v593_v50 = vsel %vm75_vm0, %v441_v47, 0.0  ;;  %v596_v3 = vsel %vm75_vm0, %v442_v39, 0.0  ;;  %v2393_v39 = vld [vmem:[#allocation11_spill] sm:$0xff] }
  0xf0   :  { %591 = vadd.xlane.f32.xlu1 %v590_v5  ;;  %v225_v51 = vpop.xlane.xlu1 %224  ;;  %594 = vadd.xlane.f32.xlu0 %v593_v50  ;;  %v222_v4 = vpop.xlane.xlu0 %221  ;;  %v2392_v5 = vld [vmem:[#allocation10_spill] sm:$0xff] }
  0xf1   :  { %v444_v45 = vmul.f32 %v380_v29, %v380_v29  ;;  %v443_v16 = vmul.f32 %v379_v44, %v379_v44  ;;  %v318_v17 = vmul.f32 0.015625, %v225_v51  ;;  %v317_v30 = vmul.f32 0.015625, %v222_v4 }
  0xf3   :  { %v382_v31 = vsub.f32 %v2384_v46, %v318_v17  ;;  %v381_v8 = vsub.f32 %v2385_v62, %v317_v30  ;;  %v599_v58 = vsel %vm75_vm0, %v443_v16, 0.0  ;;  %v602_v10 = vsel %vm75_vm0, %v444_v45, 0.0  ;;  %v2394_v45 = vld [vmem:[#allocation12_spill] sm:$0xff]  ;;  %v2395_v17 = vld [vmem:[#allocation13_spill] sm:$0xff] }
  0xf4   :  { %597 = vadd.xlane.f32.xlu1 %v596_v3  ;;  %v231_v59 = vpop.xlane.xlu1 %230  ;;  %600 = vadd.xlane.f32.xlu0 %v599_v58  ;;  %v228_v11 = vpop.xlane.xlu0 %227 }
  0xf5   :  { %v446_v9 = vmul.f32 %v382_v31, %v382_v31  ;;  %v445_v48 = vmul.f32 %v381_v8, %v381_v8  ;;  %v320_v49 = vmul.f32 0.015625, %v231_v59  ;;  %v319_v32 = vmul.f32 0.015625, %v228_v11 }
  0xf7   :  { %v384_v63 = vsub.f32 %v2386_v33, %v320_v49  ;;  %v383_v20 = vsub.f32 %v2387_v14, %v319_v32  ;;  %v605_v18 = vsel %vm75_vm0, %v445_v48, 0.0  ;;  %v608_v21 = vsel %vm75_vm0, %v446_v9, 0.0  ;;  %v2396_v9 = vld [vmem:[#allocation14_spill] sm:$0xff]  ;;  %v2397_v49 = vld [vmem:[#allocation15_spill] sm:$0xff] }
  0xf8   :  { %603 = vadd.xlane.f32.xlu1 %v602_v10  ;;  %v237_v19 = vpop.xlane.xlu1 %236  ;;  %606 = vadd.xlane.f32.xlu0 %v605_v18  ;;  %v234_v15 = vpop.xlane.xlu0 %233 }
  0xf9   :  { %v448_v0 = vmul.f32 %v384_v63, %v384_v63  ;;  %v447_v52 = vmul.f32 %v383_v20, %v383_v20  ;;  %v322_v53 = vmul.f32 0.015625, %v237_v19  ;;  %v321_v55 = vmul.f32 0.015625, %v234_v15 }
  0xfb   :  { %v386_v36 = vsub.f32 %v2388_v1, %v322_v53  ;;  %v385_v27 = vsub.f32 %v2389_v26, %v321_v55  ;;  %v611_v37 = vsel %vm75_vm0, %v447_v52, 0.0  ;;  %v614_v23 = vsel %vm75_vm0, %v448_v0, 0.0  ;;  %v2398_v0 = vld [vmem:[#allocation16_spill] sm:$0xff]  ;;  %v2399_v53 = vld [vmem:[#allocation17_spill] sm:$0xff] }
  0xfc   :  { %609 = vadd.xlane.f32.xlu1 %v608_v21  ;;  %v243_v54 = vpop.xlane.xlu1 %242  ;;  %612 = vadd.xlane.f32.xlu0 %v611_v37  ;;  %v240_v12 = vpop.xlane.xlu0 %239 }
  0xfd   :  { %v450_v13 = vmul.f32 %v386_v36, %v386_v36  ;;  %v449_v56 = vmul.f32 %v385_v27, %v385_v27  ;;  %v324_v57 = vmul.f32 0.015625, %v243_v54  ;;  %v323_v24 = vmul.f32 0.015625, %v240_v12 }
  0xff   :  { %v388_v35 = vsub.f32 %v2390_v34, %v324_v57  ;;  %v387_v22 = vsub.f32 %v2391_v25, %v323_v24  ;;  %v617_v38 = vsel %vm75_vm0, %v449_v56, 0.0  ;;  %v620_v41 = vsel %vm75_vm0, %v450_v13, 0.0 }
 0x100   :  { %615 = vadd.xlane.f32.xlu1 %v614_v23  ;;  %v249_v40 = vpop.xlane.xlu1 %248  ;;  %618 = vadd.xlane.f32.xlu0 %v617_v38  ;;  %v246_v2 = vpop.xlane.xlu0 %245 }
 0x101   :  { %v452_v60 = vmul.f32 %v388_v35, %v388_v35  ;;  %v451_v61 = vmul.f32 %v387_v22, %v387_v22  ;;  %v326_v42 = vmul.f32 0.015625, %v249_v40  ;;  %v325_v43 = vmul.f32 0.015625, %v246_v2 }
 0x103   :  { %v390_v7 = vsub.f32 %v2392_v5, %v326_v42  ;;  %v389_v47 = vsub.f32 %v2393_v39, %v325_v43  ;;  %v623_v6 = vsel %vm75_vm0, %v451_v61, 0.0  ;;  %v626_v29 = vsel %vm75_vm0, %v452_v60, 0.0  ;;  %v1835_v39 = vld [vmem:[%s2350_s1] ss:$0 sm:$0xff] }
 0x104   :  { %621 = vadd.xlane.f32.xlu1 %v620_v41  ;;  %v255_v28 = vpop.xlane.xlu1 %254  ;;  %624 = vadd.xlane.f32.xlu0 %v623_v6  ;;  %v252_v44 = vpop.xlane.xlu0 %251 }
 0x105   :  { %v454_v50 = vmul.f32 %v390_v7, %v390_v7  ;;  %v453_v51 = vmul.f32 %v389_v47, %v389_v47  ;;  %v328_v3 = vmul.f32 0.015625, %v255_v28  ;;  %v327_v4 = vmul.f32 0.015625, %v252_v44  ;;  %v1177_v28 = vld [vmem:[%s2349_s0] sm:$0xff] }
 0x107   :  { %v392_v16 = vsub.f32 %v2394_v45, %v328_v3  ;;  %v391_v30 = vsub.f32 %v2395_v17, %v327_v4  ;;  %v629_v46 = vsel %vm75_vm0, %v453_v51, 0.0  ;;  %v632_v62 = vsel %vm75_vm0, %v454_v50, 0.0 }
 0x108   :  { %627 = vadd.xlane.f32.xlu1 %v626_v29  ;;  %v261_v31 = vpop.xlane.xlu1 %260  ;;  %630 = vadd.xlane.f32.xlu0 %v629_v46  ;;  %v258_v8 = vpop.xlane.xlu0 %257  ;;  %v1178_v46 = vld [vmem:[%s2349_s0 + $0x8] sm:$0xff] }
 0x109   :  { %v456_v58 = vmul.f32 %v392_v16, %v392_v16  ;;  %v455_v59 = vmul.f32 %v391_v30, %v391_v30  ;;  %v330_v10 = vmul.f32 0.015625, %v261_v31  ;;  %v329_v11 = vmul.f32 0.015625, %v258_v8 }
 0x10b   :  { %v394_v48 = vsub.f32 %v2396_v9, %v330_v10  ;;  %v393_v32 = vsub.f32 %v2397_v49, %v329_v11  ;;  %v635_v33 = vsel %vm75_vm0, %v455_v59, 0.0  ;;  %v638_v14 = vsel %vm75_vm0, %v456_v58, 0.0  ;;  %v1179_v58 = vld [vmem:[%s2349_s0 + $0x10] sm:$0xff] }
 0x10c   :  { %633 = vadd.xlane.f32.xlu1 %v632_v62  ;;  %v267_v63 = vpop.xlane.xlu1 %266  ;;  %636 = vadd.xlane.f32.xlu0 %v635_v33  ;;  %v264_v20 = vpop.xlane.xlu0 %263 }
 0x10d   :  { %v458_v18 = vmul.f32 %v394_v48, %v394_v48  ;;  %v457_v19 = vmul.f32 %v393_v32, %v393_v32  ;;  %v332_v21 = vmul.f32 0.015625, %v267_v63  ;;  %v331_v15 = vmul.f32 0.015625, %v264_v20 }
 0x10f   :  { %v396_v52 = vsub.f32 %v2398_v0, %v332_v21  ;;  %v395_v55 = vsub.f32 %v2399_v53, %v331_v15  ;;  %v641_v1 = vsel %vm75_vm0, %v457_v19, 0.0  ;;  %v644_v27 = vsel %vm75_vm0, %v458_v18, 0.0  ;;  %v1181_v21 = vld [vmem:[%s2349_s0 + $0x20] sm:$0xff] }
 0x110   :  { %639 = vadd.xlane.f32.xlu1 %v638_v14  ;;  %642 = vadd.xlane.f32.xlu0 %v641_v1  ;;  %v1180_v14 = vld [vmem:[%s2349_s0 + $0x18] sm:$0xff] }
 0x111   :  { %v460_v36 = vmul.f32 %v396_v52, %v396_v52  ;;  %v459_v26 = vmul.f32 %v395_v55, %v395_v55 }
 0x113   :  { %v647_v37 = vsel %vm75_vm0, %v459_v26, 0.0  ;;  %v650_v54 = vsel %vm75_vm0, %v460_v36, 0.0 }
 0x114   :  { %645 = vadd.xlane.f32.xlu1 %v644_v27  ;;  %648 = vadd.xlane.f32.xlu0 %v647_v37  ;;  %v1182_v37 = vld [vmem:[%s2349_s0 + $0x28] sm:$0xff] }
 0x118   :  { %651 = vadd.xlane.f32.xlu1 %v650_v54 }
 0x125   :  { %v463_v23 = vpop.xlane.xlu0 %462 }
 0x126   :  { %v653_v12 = vmul.f32 0.015625, %v463_v23 }
 0x128   :  { %v717_v13 = vadd.f32 1e-05, %v653_v12 }
 0x129   :  { %v466_v56 = vpop.xlane.xlu1 %465  ;;  %v469_v57 = vpop.xlane.xlu0 %468 }
 0x12a   :  { %1049 = vrsqrt.f32 %v717_v13  ;;  %v654_v24 = vmul.f32 0.015625, %v466_v56  ;;  %v655_v34 = vmul.f32 0.015625, %v469_v57  ;;  %v1183_v13 = vld [vmem:[%s2349_s0 + $0x30] sm:$0xff] }
 0x12c   :  { %v718_v35 = vadd.f32 1e-05, %v654_v24  ;;  %v719_v25 = vadd.f32 1e-05, %v655_v34 }
 0x12d   :  { %v472_v22 = vpop.xlane.xlu1 %471  ;;  %v475_v38 = vpop.xlane.xlu0 %474 }
 0x12e   :  { %1051 = vrsqrt.f32 %v718_v35  ;;  %v656_v40 = vmul.f32 0.015625, %v472_v22  ;;  %v657_v41 = vmul.f32 0.015625, %v475_v38 }
 0x12f   :  { %1053 = vrsqrt.f32 %v719_v25 }
 0x130   :  { %v720_v2 = vadd.f32 1e-05, %v656_v40  ;;  %v721_v60 = vadd.f32 1e-05, %v657_v41  ;;  %v1184_v41 = vld [vmem:[%s2349_s0 + $0x38] sm:$0xff] }
 0x131   :  { %v478_v61 = vpop.xlane.xlu1 %477  ;;  %v481_v42 = vpop.xlane.xlu0 %480 }
 0x132   :  { %1055 = vrsqrt.f32 %v720_v2  ;;  %v658_v43 = vmul.f32 0.015625, %v478_v61  ;;  %v659_v5 = vmul.f32 0.015625, %v481_v42  ;;  %v1185_v42 = vld [vmem:[%s2349_s0 + $0x40] sm:$0xff] }
 0x133   :  { %1057 = vrsqrt.f32 %v721_v60 }
 0x134   :  { %v1050_v7 = vpop.eup %1049  ;;  %v722_v47 = vadd.f32 1e-05, %v658_v43  ;;  %v723_v6 = vadd.f32 1e-05, %v659_v5 }
 0x135   :  { %v846_v29 = vmul.f32 %v1177_v28, %v1050_v7  ;;  %v484_v44 = vpop.xlane.xlu1 %483  ;;  %v487_v50 = vpop.xlane.xlu0 %486 }
 0x136   :  { %1059 = vrsqrt.f32 %v722_v47  ;;  %v660_v51 = vmul.f32 0.015625, %v484_v44  ;;  %v661_v3 = vmul.f32 0.015625, %v487_v50 }
 0x137   :  { %v916_v4 = vmul.f32 %v1835_v39, %v846_v29  ;;  %1061 = vrsqrt.f32 %v723_v6 }
 0x138   :  { %v1052_v45 = vpop.eup %1051  ;;  %v724_v16 = vadd.f32 1e-05, %v660_v51  ;;  %v725_v17 = vadd.f32 1e-05, %v661_v3  ;;  %v1186_v51 = vld [vmem:[%s2349_s0 + $0x48] sm:$0xff] }
 0x139   :  { %v1054_v30 = vpop.eup %1053  ;;  %980 = vst.msk [vmem:[%s2351_s2] sm:$0xff] %vm75_vm0, %v916_v4  ;;  %v847_v31 = vmul.f32 %v1178_v46, %v1052_v45  ;;  %v490_v62 = vpop.xlane.xlu1 %489 }
 0x13a   :  { %v493_v8 = vpop.xlane.xlu0 %492  ;;  %v848_v59 = vmul.f32 %v1179_v58, %v1054_v30  ;;  %1063 = vrsqrt.f32 %v724_v16  ;;  %v662_v10 = vmul.f32 0.015625, %v490_v62  ;;  %v1187_v16 = vld [vmem:[%s2349_s0 + $0x50] sm:$0xff] }
 0x13b   :  { %v663_v11 = vmul.f32 0.015625, %v493_v8  ;;  %v917_v9 = vmul.f32 %v1835_v39, %v847_v31  ;;  %1065 = vrsqrt.f32 %v725_v17 }
 0x13c   :  { %v1056_v48 = vpop.eup %1055  ;;  %v918_v49 = vmul.f32 %v1835_v39, %v848_v59  ;;  %v726_v32 = vadd.f32 1e-05, %v662_v10 }
 0x13d   :  { %v727_v33 = vadd.f32 1e-05, %v663_v11  ;;  %v1058_v63 = vpop.eup %1057  ;;  %981 = vst.msk [vmem:[%s2351_s2 + $0x8] sm:$0xff] %vm75_vm0, %v917_v9  ;;  %v849_v20 = vmul.f32 %v1180_v14, %v1056_v48  ;;  %v496_v18 = vpop.xlane.xlu1 %495  ;;  %v1188_v11 = vld [vmem:[%s2349_s0 + $0x58] sm:$0xff] }
 0x13e   :  { %v499_v19 = vpop.xlane.xlu0 %498  ;;  %982 = vst.msk [vmem:[%s2351_s2 + $0x10] sm:$0xff] %vm75_vm0, %v918_v49  ;;  %v850_v15 = vmul.f32 %v1181_v21, %v1058_v63  ;;  %1067 = vrsqrt.f32 %v726_v32  ;;  %v664_v0 = vmul.f32 0.015625, %v496_v18  ;;  %v1189_v32 = vld [vmem:[%s2349_s0 + $0x60] sm:$0xff] }
 0x13f   :  { %v665_v52 = vmul.f32 0.015625, %v499_v19  ;;  %v919_v53 = vmul.f32 %v1835_v39, %v849_v20  ;;  %1069 = vrsqrt.f32 %v727_v33 }
 0x140   :  { %v1060_v55 = vpop.eup %1059  ;;  %v920_v1 = vmul.f32 %v1835_v39, %v850_v15  ;;  %v728_v36 = vadd.f32 1e-05, %v664_v0 }
 0x141   :  { %v729_v26 = vadd.f32 1e-05, %v665_v52  ;;  %v1062_v27 = vpop.eup %1061  ;;  %983 = vst.msk [vmem:[%s2351_s2 + $0x18] sm:$0xff] %vm75_vm0, %v919_v53  ;;  %v851_v54 = vmul.f32 %v1182_v37, %v1060_v55  ;;  %v502_v23 = vpop.xlane.xlu1 %501  ;;  %v1190_v52 = vld [vmem:[%s2349_s0 + $0x68] sm:$0xff] }
 0x142   :  { %v505_v12 = vpop.xlane.xlu0 %504  ;;  %984 = vst.msk [vmem:[%s2351_s2 + $0x20] sm:$0xff] %vm75_vm0, %v920_v1  ;;  %v852_v56 = vmul.f32 %v1183_v13, %v1062_v27  ;;  %1071 = vrsqrt.f32 %v728_v36  ;;  %v666_v57 = vmul.f32 0.015625, %v502_v23  ;;  %v1191_v36 = vld [vmem:[%s2349_s0 + $0x70] sm:$0xff] }
 0x143   :  { %v667_v24 = vmul.f32 0.015625, %v505_v12  ;;  %v921_v34 = vmul.f32 %v1835_v39, %v851_v54  ;;  %1073 = vrsqrt.f32 %v729_v26 }
 0x144   :  { %v1064_v35 = vpop.eup %1063  ;;  %v922_v25 = vmul.f32 %v1835_v39, %v852_v56  ;;  %v730_v22 = vadd.f32 1e-05, %v666_v57 }
 0x145   :  { %v731_v38 = vadd.f32 1e-05, %v667_v24  ;;  %v1066_v40 = vpop.eup %1065  ;;  %985 = vst.msk [vmem:[%s2351_s2 + $0x28] sm:$0xff] %vm75_vm0, %v921_v34  ;;  %v853_v2 = vmul.f32 %v1184_v41, %v1064_v35  ;;  %v508_v60 = vpop.xlane.xlu1 %507  ;;  %v1192_v24 = vld [vmem:[%s2349_s0 + $0x78] sm:$0xff] }
 0x146   :  { %v511_v61 = vpop.xlane.xlu0 %510  ;;  %986 = vst.msk [vmem:[%s2351_s2 + $0x30] sm:$0xff] %vm75_vm0, %v922_v25  ;;  %v854_v43 = vmul.f32 %v1185_v42, %v1066_v40  ;;  %1075 = vrsqrt.f32 %v730_v22  ;;  %v668_v5 = vmul.f32 0.015625, %v508_v60  ;;  %v1193_v22 = vld [vmem:[%s2349_s0 + $0x80] sm:$0xff] }
 0x147   :  { %v669_v7 = vmul.f32 0.015625, %v511_v61  ;;  %v923_v47 = vmul.f32 %v1835_v39, %v853_v2  ;;  %1077 = vrsqrt.f32 %v731_v38 }
 0x148   :  { %v1068_v6 = vpop.eup %1067  ;;  %v924_v28 = vmul.f32 %v1835_v39, %v854_v43  ;;  %v732_v29 = vadd.f32 1e-05, %v668_v5 }
 0x149   :  { %v733_v44 = vadd.f32 1e-05, %v669_v7  ;;  %v1070_v50 = vpop.eup %1069  ;;  %987 = vst.msk [vmem:[%s2351_s2 + $0x38] sm:$0xff] %vm75_vm0, %v923_v47  ;;  %v855_v3 = vmul.f32 %v1186_v51, %v1068_v6  ;;  %v514_v4 = vpop.xlane.xlu1 %513  ;;  %v1194_v7 = vld [vmem:[%s2349_s0 + $0x88] sm:$0xff] }
 0x14a   :  { %v517_v45 = vpop.xlane.xlu0 %516  ;;  %988 = vst.msk [vmem:[%s2351_s2 + $0x40] sm:$0xff] %vm75_vm0, %v924_v28  ;;  %v856_v17 = vmul.f32 %v1187_v16, %v1070_v50  ;;  %1079 = vrsqrt.f32 %v732_v29  ;;  %v670_v30 = vmul.f32 0.015625, %v514_v4  ;;  %v1195_v29 = vld [vmem:[%s2349_s0 + $0x90] sm:$0xff] }
 0x14b   :  { %v671_v46 = vmul.f32 0.015625, %v517_v45  ;;  %v925_v31 = vmul.f32 %v1835_v39, %v855_v3  ;;  %1081 = vrsqrt.f32 %v733_v44 }
 0x14c   :  { %v1072_v62 = vpop.eup %1071  ;;  %v926_v8 = vmul.f32 %v1835_v39, %v856_v17  ;;  %v734_v58 = vadd.f32 1e-05, %v670_v30 }
 0x14d   :  { %v735_v59 = vadd.f32 1e-05, %v671_v46  ;;  %v1074_v10 = vpop.eup %1073  ;;  %989 = vst.msk [vmem:[%s2351_s2 + $0x48] sm:$0xff] %vm75_vm0, %v925_v31  ;;  %v857_v9 = vmul.f32 %v1188_v11, %v1072_v62  ;;  %v520_v48 = vpop.xlane.xlu1 %519  ;;  %v1196_v46 = vld [vmem:[%s2349_s0 + $0x98] sm:$0xff] }
 0x14e   :  { %v523_v49 = vpop.xlane.xlu0 %522  ;;  %990 = vst.msk [vmem:[%s2351_s2 + $0x50] sm:$0xff] %vm75_vm0, %v926_v8  ;;  %v858_v33 = vmul.f32 %v1189_v32, %v1074_v10  ;;  %1083 = vrsqrt.f32 %v734_v58  ;;  %v672_v63 = vmul.f32 0.015625, %v520_v48  ;;  %v1197_v58 = vld [vmem:[%s2349_s0 + $0xa0] sm:$0xff] }
 0x14f   :  { %v673_v14 = vmul.f32 0.015625, %v523_v49  ;;  %v927_v20 = vmul.f32 %v1835_v39, %v857_v9  ;;  %1085 = vrsqrt.f32 %v735_v59 }
 0x150   :  { %v1076_v18 = vpop.eup %1075  ;;  %v928_v19 = vmul.f32 %v1835_v39, %v858_v33  ;;  %v736_v21 = vadd.f32 1e-05, %v672_v63 }
 0x151   :  { %v737_v15 = vadd.f32 1e-05, %v673_v14  ;;  %v1078_v0 = vpop.eup %1077  ;;  %991 = vst.msk [vmem:[%s2351_s2 + $0x58] sm:$0xff] %vm75_vm0, %v927_v20  ;;  %v859_v53 = vmul.f32 %v1190_v52, %v1076_v18  ;;  %v526_v55 = vpop.xlane.xlu1 %525  ;;  %v1198_v14 = vld [vmem:[%s2349_s0 + $0xa8] sm:$0xff] }
 0x152   :  { %v529_v1 = vpop.xlane.xlu0 %528  ;;  %992 = vst.msk [vmem:[%s2351_s2 + $0x60] sm:$0xff] %vm75_vm0, %v928_v19  ;;  %v860_v26 = vmul.f32 %v1191_v36, %v1078_v0  ;;  %1087 = vrsqrt.f32 %v736_v21  ;;  %v674_v27 = vmul.f32 0.015625, %v526_v55  ;;  %v1199_v21 = vld [vmem:[%s2349_s0 + $0xb0] sm:$0xff] }
 0x153   :  { %v675_v37 = vmul.f32 0.015625, %v529_v1  ;;  %v929_v54 = vmul.f32 %v1835_v39, %v859_v53  ;;  %1089 = vrsqrt.f32 %v737_v15 }
 0x154   :  { %v1080_v23 = vpop.eup %1079  ;;  %v930_v12 = vmul.f32 %v1835_v39, %v860_v26  ;;  %v738_v13 = vadd.f32 1e-05, %v674_v27 }
 0x155   :  { %v739_v56 = vadd.f32 1e-05, %v675_v37  ;;  %v1082_v57 = vpop.eup %1081  ;;  %993 = vst.msk [vmem:[%s2351_s2 + $0x68] sm:$0xff] %vm75_vm0, %v929_v54  ;;  %v861_v34 = vmul.f32 %v1192_v24, %v1080_v23  ;;  %v532_v35 = vpop.xlane.xlu1 %531  ;;  %v1200_v37 = vld [vmem:[%s2349_s0 + $0xb8] sm:$0xff] }
 0x156   :  { %v535_v25 = vpop.xlane.xlu0 %534  ;;  %994 = vst.msk [vmem:[%s2351_s2 + $0x70] sm:$0xff] %vm75_vm0, %v930_v12  ;;  %v862_v38 = vmul.f32 %v1193_v22, %v1082_v57  ;;  %1091 = vrsqrt.f32 %v738_v13  ;;  %v676_v40 = vmul.f32 0.015625, %v532_v35  ;;  %v1201_v13 = vld [vmem:[%s2349_s0 + $0xc0] sm:$0xff] }
 0x157   :  { %v677_v41 = vmul.f32 0.015625, %v535_v25  ;;  %v931_v2 = vmul.f32 %v1835_v39, %v861_v34  ;;  %1093 = vrsqrt.f32 %v739_v56 }
 0x158   :  { %v1084_v60 = vpop.eup %1083  ;;  %v932_v61 = vmul.f32 %v1835_v39, %v862_v38  ;;  %v740_v42 = vadd.f32 1e-05, %v676_v40 }
 0x159   :  { %v741_v43 = vadd.f32 1e-05, %v677_v41  ;;  %v1086_v5 = vpop.eup %1085  ;;  %995 = vst.msk [vmem:[%s2351_s2 + $0x78] sm:$0xff] %vm75_vm0, %v931_v2  ;;  %v863_v47 = vmul.f32 %v1194_v7, %v1084_v60  ;;  %v538_v6 = vpop.xlane.xlu1 %537  ;;  %v1202_v41 = vld [vmem:[%s2349_s0 + $0xc8] sm:$0xff] }
 0x15a   :  { %v541_v28 = vpop.xlane.xlu0 %540  ;;  %996 = vst.msk [vmem:[%s2351_s2 + $0x80] sm:$0xff] %vm75_vm0, %v932_v61  ;;  %v864_v44 = vmul.f32 %v1195_v29, %v1086_v5  ;;  %1095 = vrsqrt.f32 %v740_v42  ;;  %v678_v50 = vmul.f32 0.015625, %v538_v6  ;;  %v1203_v42 = vld [vmem:[%s2349_s0 + $0xd0] sm:$0xff] }
 0x15b   :  { %v679_v51 = vmul.f32 0.015625, %v541_v28  ;;  %v933_v3 = vmul.f32 %v1835_v39, %v863_v47  ;;  %1097 = vrsqrt.f32 %v741_v43 }
 0x15c   :  { %v1088_v4 = vpop.eup %1087  ;;  %v934_v45 = vmul.f32 %v1835_v39, %v864_v44  ;;  %v742_v16 = vadd.f32 1e-05, %v678_v50 }
 0x15d   :  { %v743_v17 = vadd.f32 1e-05, %v679_v51  ;;  %v1090_v30 = vpop.eup %1089  ;;  %997 = vst.msk [vmem:[%s2351_s2 + $0x88] sm:$0xff] %vm75_vm0, %v933_v3  ;;  %v865_v31 = vmul.f32 %v1196_v46, %v1088_v4  ;;  %v544_v62 = vpop.xlane.xlu1 %543  ;;  %v1204_v51 = vld [vmem:[%s2349_s0 + $0xd8] sm:$0xff] }
 0x15e   :  { %v547_v8 = vpop.xlane.xlu0 %546  ;;  %998 = vst.msk [vmem:[%s2351_s2 + $0x90] sm:$0xff] %vm75_vm0, %v934_v45  ;;  %v866_v59 = vmul.f32 %v1197_v58, %v1090_v30  ;;  %1099 = vrsqrt.f32 %v742_v16  ;;  %v680_v10 = vmul.f32 0.015625, %v544_v62  ;;  %v1205_v16 = vld [vmem:[%s2349_s0 + $0xe0] sm:$0xff] }
 0x15f   :  { %v681_v11 = vmul.f32 0.015625, %v547_v8  ;;  %v935_v9 = vmul.f32 %v1835_v39, %v865_v31  ;;  %1101 = vrsqrt.f32 %v743_v17 }
 0x160   :  { %v1092_v48 = vpop.eup %1091  ;;  %v936_v49 = vmul.f32 %v1835_v39, %v866_v59  ;;  %v744_v32 = vadd.f32 1e-05, %v680_v10 }
 0x161   :  { %v745_v33 = vadd.f32 1e-05, %v681_v11  ;;  %v1094_v63 = vpop.eup %1093  ;;  %999 = vst.msk [vmem:[%s2351_s2 + $0x98] sm:$0xff] %vm75_vm0, %v935_v9  ;;  %v867_v20 = vmul.f32 %v1198_v14, %v1092_v48  ;;  %v550_v18 = vpop.xlane.xlu1 %549  ;;  %v1206_v11 = vld [vmem:[%s2349_s0 + $0xe8] sm:$0xff] }
 0x162   :  { %v553_v19 = vpop.xlane.xlu0 %552  ;;  %1000 = vst.msk [vmem:[%s2351_s2 + $0xa0] sm:$0xff] %vm75_vm0, %v936_v49  ;;  %v868_v15 = vmul.f32 %v1199_v21, %v1094_v63  ;;  %1103 = vrsqrt.f32 %v744_v32  ;;  %v682_v0 = vmul.f32 0.015625, %v550_v18  ;;  %v1207_v32 = vld [vmem:[%s2349_s0 + $0xf0] sm:$0xff] }
 0x163   :  { %v683_v52 = vmul.f32 0.015625, %v553_v19  ;;  %v937_v53 = vmul.f32 %v1835_v39, %v867_v20  ;;  %1105 = vrsqrt.f32 %v745_v33 }
 0x164   :  { %v1096_v55 = vpop.eup %1095  ;;  %v938_v1 = vmul.f32 %v1835_v39, %v868_v15  ;;  %v746_v36 = vadd.f32 1e-05, %v682_v0 }
 0x165   :  { %v747_v26 = vadd.f32 1e-05, %v683_v52  ;;  %v1098_v27 = vpop.eup %1097  ;;  %1001 = vst.msk [vmem:[%s2351_s2 + $0xa8] sm:$0xff] %vm75_vm0, %v937_v53  ;;  %v869_v54 = vmul.f32 %v1200_v37, %v1096_v55  ;;  %v556_v23 = vpop.xlane.xlu1 %555  ;;  %v1208_v52 = vld [vmem:[%s2349_s0 + $0xf8] sm:$0xff] }
 0x166   :  { %v559_v12 = vpop.xlane.xlu0 %558  ;;  %1002 = vst.msk [vmem:[%s2351_s2 + $0xb0] sm:$0xff] %vm75_vm0, %v938_v1  ;;  %v870_v56 = vmul.f32 %v1201_v13, %v1098_v27  ;;  %1107 = vrsqrt.f32 %v746_v36  ;;  %v684_v57 = vmul.f32 0.015625, %v556_v23  ;;  %v1209_v36 = vld [vmem:[%s2349_s0 + $0x100] sm:$0xff] }
 0x167   :  { %v685_v24 = vmul.f32 0.015625, %v559_v12  ;;  %v939_v34 = vmul.f32 %v1835_v39, %v869_v54  ;;  %1109 = vrsqrt.f32 %v747_v26 }
 0x168   :  { %v1100_v35 = vpop.eup %1099  ;;  %v940_v25 = vmul.f32 %v1835_v39, %v870_v56  ;;  %v748_v22 = vadd.f32 1e-05, %v684_v57 }
 0x169   :  { %v749_v38 = vadd.f32 1e-05, %v685_v24  ;;  %v1102_v40 = vpop.eup %1101  ;;  %1003 = vst.msk [vmem:[%s2351_s2 + $0xb8] sm:$0xff] %vm75_vm0, %v939_v34  ;;  %v871_v2 = vmul.f32 %v1202_v41, %v1100_v35  ;;  %v562_v60 = vpop.xlane.xlu1 %561  ;;  %v1210_v24 = vld [vmem:[%s2349_s0 + $0x108] sm:$0xff] }
 0x16a   :  { %v565_v61 = vpop.xlane.xlu0 %564  ;;  %1004 = vst.msk [vmem:[%s2351_s2 + $0xc0] sm:$0xff] %vm75_vm0, %v940_v25  ;;  %v872_v43 = vmul.f32 %v1203_v42, %v1102_v40  ;;  %1111 = vrsqrt.f32 %v748_v22  ;;  %v686_v5 = vmul.f32 0.015625, %v562_v60  ;;  %v1211_v22 = vld [vmem:[%s2349_s0 + $0x110] sm:$0xff] }
 0x16b   :  { %v687_v7 = vmul.f32 0.015625, %v565_v61  ;;  %v941_v47 = vmul.f32 %v1835_v39, %v871_v2  ;;  %1113 = vrsqrt.f32 %v749_v38 }
 0x16c   :  { %v1104_v6 = vpop.eup %1103  ;;  %v942_v28 = vmul.f32 %v1835_v39, %v872_v43  ;;  %v750_v29 = vadd.f32 1e-05, %v686_v5 }
 0x16d   :  { %v751_v44 = vadd.f32 1e-05, %v687_v7  ;;  %v1106_v50 = vpop.eup %1105  ;;  %1005 = vst.msk [vmem:[%s2351_s2 + $0xc8] sm:$0xff] %vm75_vm0, %v941_v47  ;;  %v873_v3 = vmul.f32 %v1204_v51, %v1104_v6  ;;  %v568_v4 = vpop.xlane.xlu1 %567  ;;  %v1212_v7 = vld [vmem:[%s2349_s0 + $0x118] sm:$0xff] }
 0x16e   :  { %v571_v45 = vpop.xlane.xlu0 %570  ;;  %1006 = vst.msk [vmem:[%s2351_s2 + $0xd0] sm:$0xff] %vm75_vm0, %v942_v28  ;;  %v874_v17 = vmul.f32 %v1205_v16, %v1106_v50  ;;  %1115 = vrsqrt.f32 %v750_v29  ;;  %v688_v30 = vmul.f32 0.015625, %v568_v4  ;;  %v1213_v29 = vld [vmem:[%s2349_s0 + $0x120] sm:$0xff] }
 0x16f   :  { %v689_v46 = vmul.f32 0.015625, %v571_v45  ;;  %v943_v31 = vmul.f32 %v1835_v39, %v873_v3  ;;  %1117 = vrsqrt.f32 %v751_v44 }
 0x170   :  { %v1108_v62 = vpop.eup %1107  ;;  %v944_v8 = vmul.f32 %v1835_v39, %v874_v17  ;;  %v752_v58 = vadd.f32 1e-05, %v688_v30 }
 0x171   :  { %v753_v59 = vadd.f32 1e-05, %v689_v46  ;;  %v1110_v10 = vpop.eup %1109  ;;  %1007 = vst.msk [vmem:[%s2351_s2 + $0xd8] sm:$0xff] %vm75_vm0, %v943_v31  ;;  %v875_v9 = vmul.f32 %v1206_v11, %v1108_v62  ;;  %v574_v48 = vpop.xlane.xlu1 %573  ;;  %v1214_v46 = vld [vmem:[%s2349_s0 + $0x128] sm:$0xff] }
 0x172   :  { %v577_v49 = vpop.xlane.xlu0 %576  ;;  %1008 = vst.msk [vmem:[%s2351_s2 + $0xe0] sm:$0xff] %vm75_vm0, %v944_v8  ;;  %v876_v33 = vmul.f32 %v1207_v32, %v1110_v10  ;;  %1119 = vrsqrt.f32 %v752_v58  ;;  %v690_v63 = vmul.f32 0.015625, %v574_v48  ;;  %v1215_v58 = vld [vmem:[%s2349_s0 + $0x130] sm:$0xff] }
 0x173   :  { %v691_v14 = vmul.f32 0.015625, %v577_v49  ;;  %v945_v20 = vmul.f32 %v1835_v39, %v875_v9  ;;  %1121 = vrsqrt.f32 %v753_v59 }
 0x174   :  { %v1112_v18 = vpop.eup %1111  ;;  %v946_v19 = vmul.f32 %v1835_v39, %v876_v33  ;;  %v754_v21 = vadd.f32 1e-05, %v690_v63 }
 0x175   :  { %v755_v15 = vadd.f32 1e-05, %v691_v14  ;;  %v1114_v0 = vpop.eup %1113  ;;  %1009 = vst.msk [vmem:[%s2351_s2 + $0xe8] sm:$0xff] %vm75_vm0, %v945_v20  ;;  %v877_v53 = vmul.f32 %v1208_v52, %v1112_v18  ;;  %v580_v55 = vpop.xlane.xlu1 %579  ;;  %v1216_v14 = vld [vmem:[%s2349_s0 + $0x138] sm:$0xff] }
 0x176   :  { %v583_v1 = vpop.xlane.xlu0 %582  ;;  %1010 = vst.msk [vmem:[%s2351_s2 + $0xf0] sm:$0xff] %vm75_vm0, %v946_v19  ;;  %v878_v26 = vmul.f32 %v1209_v36, %v1114_v0  ;;  %1123 = vrsqrt.f32 %v754_v21  ;;  %v692_v27 = vmul.f32 0.015625, %v580_v55  ;;  %v1217_v21 = vld [vmem:[%s2349_s0 + $0x140] sm:$0xff] }
 0x177   :  { %v693_v37 = vmul.f32 0.015625, %v583_v1  ;;  %v947_v54 = vmul.f32 %v1835_v39, %v877_v53  ;;  %1125 = vrsqrt.f32 %v755_v15 }
 0x178   :  { %v1116_v23 = vpop.eup %1115  ;;  %v948_v12 = vmul.f32 %v1835_v39, %v878_v26  ;;  %v756_v13 = vadd.f32 1e-05, %v692_v27 }
 0x179   :  { %v757_v56 = vadd.f32 1e-05, %v693_v37  ;;  %v1118_v57 = vpop.eup %1117  ;;  %1011 = vst.msk [vmem:[%s2351_s2 + $0xf8] sm:$0xff] %vm75_vm0, %v947_v54  ;;  %v879_v34 = vmul.f32 %v1210_v24, %v1116_v23  ;;  %v586_v35 = vpop.xlane.xlu1 %585  ;;  %v1218_v37 = vld [vmem:[%s2349_s0 + $0x148] sm:$0xff] }
 0x17a   :  { %v589_v25 = vpop.xlane.xlu0 %588  ;;  %1012 = vst.msk [vmem:[%s2351_s2 + $0x100] sm:$0xff] %vm75_vm0, %v948_v12  ;;  %v880_v38 = vmul.f32 %v1211_v22, %v1118_v57  ;;  %1127 = vrsqrt.f32 %v756_v13  ;;  %v694_v40 = vmul.f32 0.015625, %v586_v35  ;;  %v1219_v13 = vld [vmem:[%s2349_s0 + $0x150] sm:$0xff] }
 0x17b   :  { %v695_v41 = vmul.f32 0.015625, %v589_v25  ;;  %v949_v2 = vmul.f32 %v1835_v39, %v879_v34  ;;  %1129 = vrsqrt.f32 %v757_v56 }
 0x17c   :  { %v1120_v60 = vpop.eup %1119  ;;  %v950_v61 = vmul.f32 %v1835_v39, %v880_v38  ;;  %v758_v42 = vadd.f32 1e-05, %v694_v40 }
 0x17d   :  { %v759_v43 = vadd.f32 1e-05, %v695_v41  ;;  %v1122_v5 = vpop.eup %1121  ;;  %1013 = vst.msk [vmem:[%s2351_s2 + $0x108] sm:$0xff] %vm75_vm0, %v949_v2  ;;  %v881_v47 = vmul.f32 %v1212_v7, %v1120_v60  ;;  %v592_v6 = vpop.xlane.xlu1 %591  ;;  %v1220_v41 = vld [vmem:[%s2349_s0 + $0x158] sm:$0xff] }
 0x17e   :  { %v595_v28 = vpop.xlane.xlu0 %594  ;;  %1014 = vst.msk [vmem:[%s2351_s2 + $0x110] sm:$0xff] %vm75_vm0, %v950_v61  ;;  %v882_v44 = vmul.f32 %v1213_v29, %v1122_v5  ;;  %1131 = vrsqrt.f32 %v758_v42  ;;  %v696_v50 = vmul.f32 0.015625, %v592_v6  ;;  %v1221_v42 = vld [vmem:[%s2349_s0 + $0x160] sm:$0xff] }
 0x17f   :  { %v697_v51 = vmul.f32 0.015625, %v595_v28  ;;  %v951_v3 = vmul.f32 %v1835_v39, %v881_v47  ;;  %1133 = vrsqrt.f32 %v759_v43 }
 0x180   :  { %v1124_v4 = vpop.eup %1123  ;;  %v952_v45 = vmul.f32 %v1835_v39, %v882_v44  ;;  %v760_v16 = vadd.f32 1e-05, %v696_v50 }
 0x181   :  { %v761_v17 = vadd.f32 1e-05, %v697_v51  ;;  %v1126_v30 = vpop.eup %1125  ;;  %1015 = vst.msk [vmem:[%s2351_s2 + $0x118] sm:$0xff] %vm75_vm0, %v951_v3  ;;  %v883_v31 = vmul.f32 %v1214_v46, %v1124_v4  ;;  %v598_v62 = vpop.xlane.xlu1 %597  ;;  %v1222_v51 = vld [vmem:[%s2349_s0 + $0x168] sm:$0xff] }
 0x182   :  { %v601_v8 = vpop.xlane.xlu0 %600  ;;  %1016 = vst.msk [vmem:[%s2351_s2 + $0x120] sm:$0xff] %vm75_vm0, %v952_v45  ;;  %v884_v59 = vmul.f32 %v1215_v58, %v1126_v30  ;;  %1135 = vrsqrt.f32 %v760_v16  ;;  %v698_v10 = vmul.f32 0.015625, %v598_v62  ;;  %v1223_v16 = vld [vmem:[%s2349_s0 + $0x170] sm:$0xff] }
 0x183   :  { %v699_v11 = vmul.f32 0.015625, %v601_v8  ;;  %v953_v9 = vmul.f32 %v1835_v39, %v883_v31  ;;  %1137 = vrsqrt.f32 %v761_v17 }
 0x184   :  { %v1128_v48 = vpop.eup %1127  ;;  %v954_v49 = vmul.f32 %v1835_v39, %v884_v59  ;;  %v762_v32 = vadd.f32 1e-05, %v698_v10 }
 0x185   :  { %v763_v33 = vadd.f32 1e-05, %v699_v11  ;;  %v1130_v63 = vpop.eup %1129  ;;  %1017 = vst.msk [vmem:[%s2351_s2 + $0x128] sm:$0xff] %vm75_vm0, %v953_v9  ;;  %v885_v20 = vmul.f32 %v1216_v14, %v1128_v48  ;;  %v604_v18 = vpop.xlane.xlu1 %603  ;;  %v1224_v11 = vld [vmem:[%s2349_s0 + $0x178] sm:$0xff] }
 0x186   :  { %v607_v19 = vpop.xlane.xlu0 %606  ;;  %1018 = vst.msk [vmem:[%s2351_s2 + $0x130] sm:$0xff] %vm75_vm0, %v954_v49  ;;  %v886_v15 = vmul.f32 %v1217_v21, %v1130_v63  ;;  %1139 = vrsqrt.f32 %v762_v32  ;;  %v700_v0 = vmul.f32 0.015625, %v604_v18  ;;  %v1225_v32 = vld [vmem:[%s2349_s0 + $0x180] sm:$0xff] }
 0x187   :  { %v701_v52 = vmul.f32 0.015625, %v607_v19  ;;  %v955_v53 = vmul.f32 %v1835_v39, %v885_v20  ;;  %1141 = vrsqrt.f32 %v763_v33 }
 0x188   :  { %v1132_v55 = vpop.eup %1131  ;;  %v956_v1 = vmul.f32 %v1835_v39, %v886_v15  ;;  %v764_v36 = vadd.f32 1e-05, %v700_v0 }
 0x189   :  { %v765_v26 = vadd.f32 1e-05, %v701_v52  ;;  %v1134_v27 = vpop.eup %1133  ;;  %1019 = vst.msk [vmem:[%s2351_s2 + $0x138] sm:$0xff] %vm75_vm0, %v955_v53  ;;  %v887_v54 = vmul.f32 %v1218_v37, %v1132_v55  ;;  %v610_v23 = vpop.xlane.xlu1 %609  ;;  %v1226_v52 = vld [vmem:[%s2349_s0 + $0x188] sm:$0xff] }
 0x18a   :  { %v613_v12 = vpop.xlane.xlu0 %612  ;;  %1020 = vst.msk [vmem:[%s2351_s2 + $0x140] sm:$0xff] %vm75_vm0, %v956_v1  ;;  %v888_v56 = vmul.f32 %v1219_v13, %v1134_v27  ;;  %1143 = vrsqrt.f32 %v764_v36  ;;  %v702_v57 = vmul.f32 0.015625, %v610_v23  ;;  %v1227_v36 = vld [vmem:[%s2349_s0 + $0x190] sm:$0xff] }
 0x18b   :  { %v703_v24 = vmul.f32 0.015625, %v613_v12  ;;  %v957_v34 = vmul.f32 %v1835_v39, %v887_v54  ;;  %1145 = vrsqrt.f32 %v765_v26 }
 0x18c   :  { %v1136_v35 = vpop.eup %1135  ;;  %v958_v25 = vmul.f32 %v1835_v39, %v888_v56  ;;  %v766_v22 = vadd.f32 1e-05, %v702_v57 }
 0x18d   :  { %v767_v38 = vadd.f32 1e-05, %v703_v24  ;;  %v1138_v40 = vpop.eup %1137  ;;  %1021 = vst.msk [vmem:[%s2351_s2 + $0x148] sm:$0xff] %vm75_vm0, %v957_v34  ;;  %v889_v2 = vmul.f32 %v1220_v41, %v1136_v35  ;;  %v616_v60 = vpop.xlane.xlu1 %615  ;;  %v1228_v24 = vld [vmem:[%s2349_s0 + $0x198] sm:$0xff] }
 0x18e   :  { %v619_v61 = vpop.xlane.xlu0 %618  ;;  %1022 = vst.msk [vmem:[%s2351_s2 + $0x150] sm:$0xff] %vm75_vm0, %v958_v25  ;;  %v890_v43 = vmul.f32 %v1221_v42, %v1138_v40  ;;  %1147 = vrsqrt.f32 %v766_v22  ;;  %v704_v5 = vmul.f32 0.015625, %v616_v60  ;;  %v1229_v22 = vld [vmem:[%s2349_s0 + $0x1a0] sm:$0xff] }
 0x18f   :  { %v705_v7 = vmul.f32 0.015625, %v619_v61  ;;  %v959_v47 = vmul.f32 %v1835_v39, %v889_v2  ;;  %1149 = vrsqrt.f32 %v767_v38 }
 0x190   :  { %v1140_v6 = vpop.eup %1139  ;;  %v960_v28 = vmul.f32 %v1835_v39, %v890_v43  ;;  %v768_v29 = vadd.f32 1e-05, %v704_v5 }
 0x191   :  { %v769_v44 = vadd.f32 1e-05, %v705_v7  ;;  %v1142_v50 = vpop.eup %1141  ;;  %1023 = vst.msk [vmem:[%s2351_s2 + $0x158] sm:$0xff] %vm75_vm0, %v959_v47  ;;  %v891_v3 = vmul.f32 %v1222_v51, %v1140_v6  ;;  %v622_v4 = vpop.xlane.xlu1 %621  ;;  %v1230_v7 = vld [vmem:[%s2349_s0 + $0x1a8] sm:$0xff] }
 0x192   :  { %v625_v45 = vpop.xlane.xlu0 %624  ;;  %1024 = vst.msk [vmem:[%s2351_s2 + $0x160] sm:$0xff] %vm75_vm0, %v960_v28  ;;  %v892_v17 = vmul.f32 %v1223_v16, %v1142_v50  ;;  %1151 = vrsqrt.f32 %v768_v29  ;;  %v706_v30 = vmul.f32 0.015625, %v622_v4  ;;  %v1231_v29 = vld [vmem:[%s2349_s0 + $0x1b0] sm:$0xff] }
 0x193   :  { %v707_v46 = vmul.f32 0.015625, %v625_v45  ;;  %v961_v31 = vmul.f32 %v1835_v39, %v891_v3  ;;  %1153 = vrsqrt.f32 %v769_v44 }
 0x194   :  { %v1144_v62 = vpop.eup %1143  ;;  %v962_v8 = vmul.f32 %v1835_v39, %v892_v17  ;;  %v770_v58 = vadd.f32 1e-05, %v706_v30 }
 0x195   :  { %v771_v59 = vadd.f32 1e-05, %v707_v46  ;;  %v1146_v10 = vpop.eup %1145  ;;  %1025 = vst.msk [vmem:[%s2351_s2 + $0x168] sm:$0xff] %vm75_vm0, %v961_v31  ;;  %v893_v9 = vmul.f32 %v1224_v11, %v1144_v62  ;;  %v628_v48 = vpop.xlane.xlu1 %627  ;;  %v1232_v46 = vld [vmem:[%s2349_s0 + $0x1b8] sm:$0xff] }
 0x196   :  { %v631_v49 = vpop.xlane.xlu0 %630  ;;  %1026 = vst.msk [vmem:[%s2351_s2 + $0x170] sm:$0xff] %vm75_vm0, %v962_v8  ;;  %v894_v33 = vmul.f32 %v1225_v32, %v1146_v10  ;;  %1155 = vrsqrt.f32 %v770_v58  ;;  %v708_v63 = vmul.f32 0.015625, %v628_v48  ;;  %v1233_v8 = vld [vmem:[%s2349_s0 + $0x1c0] sm:$0xff]  ;;  %v1234_v32 = vld [vmem:[%s2349_s0 + $0x1c8] sm:$0xff] }
 0x197   :  { %v709_v14 = vmul.f32 0.015625, %v631_v49  ;;  %v963_v20 = vmul.f32 %v1835_v39, %v893_v9  ;;  %1157 = vrsqrt.f32 %v771_v59 }
 0x198   :  { %v1148_v18 = vpop.eup %1147  ;;  %v964_v19 = vmul.f32 %v1835_v39, %v894_v33  ;;  %v772_v21 = vadd.f32 1e-05, %v708_v63  ;;  %v1235_v63 = vld [vmem:[%s2349_s0 + $0x1d0] sm:$0xff] }
 0x199   :  { %v773_v15 = vadd.f32 1e-05, %v709_v14  ;;  %v1150_v0 = vpop.eup %1149  ;;  %1027 = vst.msk [vmem:[%s2351_s2 + $0x178] sm:$0xff] %vm75_vm0, %v963_v20  ;;  %v895_v53 = vmul.f32 %v1226_v52, %v1148_v18  ;;  %v634_v55 = vpop.xlane.xlu1 %633  ;;  %v1237_v52 = vld [vmem:[%s2349_s0 + $0x1e0] sm:$0xff] }
 0x19a   :  { %v637_v1 = vpop.xlane.xlu0 %636  ;;  %1028 = vst.msk [vmem:[%s2351_s2 + $0x180] sm:$0xff] %vm75_vm0, %v964_v19  ;;  %v896_v26 = vmul.f32 %v1227_v36, %v1150_v0  ;;  %1159 = vrsqrt.f32 %v772_v21  ;;  %v710_v27 = vmul.f32 0.015625, %v634_v55 }
 0x19b   :  { %v711_v37 = vmul.f32 0.015625, %v637_v1  ;;  %v965_v54 = vmul.f32 %v1835_v39, %v895_v53  ;;  %1161 = vrsqrt.f32 %v773_v15  ;;  %v1236_v15 = vld [vmem:[%s2349_s0 + $0x1d8] sm:$0xff] }
 0x19c   :  { %v1152_v23 = vpop.eup %1151  ;;  %v966_v12 = vmul.f32 %v1835_v39, %v896_v26  ;;  %v774_v13 = vadd.f32 1e-05, %v710_v27  ;;  %v1238_v27 = vld [vmem:[%s2349_s0 + $0x1e8] sm:$0xff] }
 0x19d   :  { %v775_v56 = vadd.f32 1e-05, %v711_v37  ;;  %v1154_v57 = vpop.eup %1153  ;;  %1029 = vst.msk [vmem:[%s2351_s2 + $0x188] sm:$0xff] %vm75_vm0, %v965_v54  ;;  %v897_v34 = vmul.f32 %v1228_v24, %v1152_v23  ;;  %v640_v35 = vpop.xlane.xlu1 %639  ;;  %v1239_v54 = vld [vmem:[%s2349_s0 + $0x1f0] sm:$0xff] }
 0x19e   :  { %v643_v25 = vpop.xlane.xlu0 %642  ;;  %1030 = vst.msk [vmem:[%s2351_s2 + $0x190] sm:$0xff] %vm75_vm0, %v966_v12  ;;  %v898_v38 = vmul.f32 %v1229_v22, %v1154_v57  ;;  %1163 = vrsqrt.f32 %v774_v13  ;;  %v712_v40 = vmul.f32 0.015625, %v640_v35  ;;  %v1240_v57 = vld [vmem:[%s2349_s0 + $0x1f8] sm:$0xff] }
 0x19f   :  { %v713_v41 = vmul.f32 0.015625, %v643_v25  ;;  %v967_v2 = vmul.f32 %v1835_v39, %v897_v34  ;;  %1165 = vrsqrt.f32 %v775_v56 }
 0x1a0   :  { %v1156_v60 = vpop.eup %1155  ;;  %v968_v61 = vmul.f32 %v1835_v39, %v898_v38  ;;  %v776_v42 = vadd.f32 1e-05, %v712_v40 }
 0x1a1   :  { %v777_v43 = vadd.f32 1e-05, %v713_v41  ;;  %v1158_v5 = vpop.eup %1157  ;;  %1031 = vst.msk [vmem:[%s2351_s2 + $0x198] sm:$0xff] %vm75_vm0, %v967_v2  ;;  %v899_v47 = vmul.f32 %v1230_v7, %v1156_v60  ;;  %v646_v6 = vpop.xlane.xlu1 %645 }
 0x1a2   :  { %v649_v28 = vpop.xlane.xlu0 %648  ;;  %1032 = vst.msk [vmem:[%s2351_s2 + $0x1a0] sm:$0xff] %vm75_vm0, %v968_v61  ;;  %v900_v44 = vmul.f32 %v1231_v29, %v1158_v5  ;;  %1167 = vrsqrt.f32 %v776_v42  ;;  %v714_v50 = vmul.f32 0.015625, %v646_v6 }
 0x1a3   :  { %v715_v51 = vmul.f32 0.015625, %v649_v28  ;;  %v969_v3 = vmul.f32 %v1835_v39, %v899_v47  ;;  %1169 = vrsqrt.f32 %v777_v43 }
 0x1a4   :  { %v1160_v4 = vpop.eup %1159  ;;  %v970_v45 = vmul.f32 %v1835_v39, %v900_v44  ;;  %v778_v16 = vadd.f32 1e-05, %v714_v50 }
 0x1a5   :  { %v779_v17 = vadd.f32 1e-05, %v715_v51  ;;  %v1162_v30 = vpop.eup %1161  ;;  %1033 = vst.msk [vmem:[%s2351_s2 + $0x1a8] sm:$0xff] %vm75_vm0, %v969_v3  ;;  %v901_v31 = vmul.f32 %v1232_v46, %v1160_v4  ;;  %v652_v62 = vpop.xlane.xlu1 %651 }
 0x1a6   :  { %1034 = vst.msk [vmem:[%s2351_s2 + $0x1b0] sm:$0xff] %vm75_vm0, %v970_v45  ;;  %v902_v58 = vmul.f32 %v1233_v8, %v1162_v30  ;;  %1171 = vrsqrt.f32 %v778_v16  ;;  %v716_v59 = vmul.f32 0.015625, %v652_v62 }
 0x1a7   :  { %v971_v10 = vmul.f32 %v1835_v39, %v901_v31  ;;  %1173 = vrsqrt.f32 %v779_v17 }
 0x1a8   :  { %v1164_v11 = vpop.eup %1163  ;;  %v972_v9 = vmul.f32 %v1835_v39, %v902_v58  ;;  %v780_v48 = vadd.f32 1e-05, %v716_v59 }
 0x1a9   :  { %v1166_v49 = vpop.eup %1165  ;;  %1035 = vst.msk [vmem:[%s2351_s2 + $0x1b8] sm:$0xff] %vm75_vm0, %v971_v10  ;;  %v903_v33 = vmul.f32 %v1234_v32, %v1164_v11 }
 0x1aa   :  { %1036 = vst.msk [vmem:[%s2351_s2 + $0x1c0] sm:$0xff] %vm75_vm0, %v972_v9  ;;  %v904_v14 = vmul.f32 %v1235_v63, %v1166_v49  ;;  %1175 = vrsqrt.f32 %v780_v48 }
 0x1ab   :  { %v973_v20 = vmul.f32 %v1835_v39, %v903_v33 }
 0x1ac   :  { %v1168_v18 = vpop.eup %1167  ;;  %v974_v19 = vmul.f32 %v1835_v39, %v904_v14 }
 0x1ad   :  { %v1170_v21 = vpop.eup %1169  ;;  %1037 = vst.msk [vmem:[%s2351_s2 + $0x1c8] sm:$0xff] %vm75_vm0, %v973_v20  ;;  %v905_v0 = vmul.f32 %v1236_v15, %v1168_v18 }
 0x1ae   :  { %1038 = vst.msk [vmem:[%s2351_s2 + $0x1d0] sm:$0xff] %vm75_vm0, %v974_v19  ;;  %v906_v53 = vmul.f32 %v1237_v52, %v1170_v21 }
 0x1af   :  { %v975_v55 = vmul.f32 %v1835_v39, %v905_v0 }
 0x1b0   :  { %v1172_v1 = vpop.eup %1171  ;;  %v976_v36 = vmul.f32 %v1835_v39, %v906_v53 }
 0x1b1   :  { %v1174_v26 = vpop.eup %1173  ;;  %1039 = vst.msk [vmem:[%s2351_s2 + $0x1d8] sm:$0xff] %vm75_vm0, %v975_v55  ;;  %v907_v37 = vmul.f32 %v1238_v27, %v1172_v1 }
 0x1b2   :  { %1040 = vst.msk [vmem:[%s2351_s2 + $0x1e0] sm:$0xff] %vm75_vm0, %v976_v36  ;;  %v908_v23 = vmul.f32 %v1239_v54, %v1174_v26 }
 0x1b3   :  { %v977_v12 = vmul.f32 %v1835_v39, %v907_v37 }
 0x1b4   :  { %v1176_v13 = vpop.eup %1175  ;;  %v978_v56 = vmul.f32 %v1835_v39, %v908_v23 }
 0x1b5   :  { %1041 = vst.msk [vmem:[%s2351_s2 + $0x1e8] sm:$0xff] %vm75_vm0, %v977_v12  ;;  %v909_v24 = vmul.f32 %v1240_v57, %v1176_v13 }
 0x1b6   :  { %1042 = vst.msk [vmem:[%s2351_s2 + $0x1f0] sm:$0xff] %vm75_vm0, %v978_v56 }
 0x1b7   :  { %v979_v34 = vmul.f32 %v1835_v39, %v909_v24 }
 0x1b9   :  { %1043 = vst.msk [vmem:[%s2351_s2 + $0x1f8] sm:$0xff] %vm75_vm0, %v979_v34 }

</bundles_post_ra>
